<compile_context>
chip_gen: v5e
topology: v5e:2x2
jax: 0.10.0
libtpu: 0.0.40
codegen_flags: <defaults>
</compile_context>

<pallas_src>
import functools

import jax
import jax.numpy as jnp
from jax import lax
from jax.experimental import pallas as pl
from jax.experimental.pallas import tpu as pltpu


_ROT_DIMS = {'rot6d': 6, 'axis_angle': 3, 'quaternion': 4}


def _elem_loss(diff, kind):
    """Elementwise reconstruction loss (static switch at trace time)."""
    if kind == 'l2':
        return diff * diff
    if kind == 'l1':
        return jnp.abs(diff)
    # 'l1_smooth' == PyTorch F.smooth_l1_loss with beta=1.0
    ad = jnp.abs(diff)
    return jnp.where(ad < 1.0, 0.5 * diff * diff, ad - 0.5)


# ----------------------------------------------------------------------------- #
# Reference-only mask builders (the kernel rebuilds these masks in-VMEM).
# TODO(synk): mmotion's batch_get_mask_rotation / batch_get_mask_joints are not
# part of the provided spec; these stand-ins zero hand-joint features for
# samples without hands.
def batch_get_mask_rotation(num_frames, has_hand, rot_type, num_rot_joints,
                            num_body_joints=22, dtype=jnp.float32):
    rot_dim = _ROT_DIMS[rot_type]
    d_rot = num_rot_joints * rot_dim
    is_hand_col = (jnp.arange(d_rot) // rot_dim) >= num_body_joints
    hand_w = has_hand.astype(dtype)[:, None, None]
    mask = jnp.where(is_hand_col[None, None, :], hand_w, jnp.asarray(1.0, dtype))
    return jnp.broadcast_to(mask, (has_hand.shape[0], num_frames, d_rot))


def batch_get_mask_joints(num_frames, has_hand, num_joints,
                          num_body_joints=22, dtype=jnp.float32):
    is_hand_j = jnp.arange(num_joints) >= num_body_joints
    hand_w = has_hand.astype(dtype)[:, None, None, None]
    mask = jnp.where(is_hand_j[None, None, :, None], hand_w, jnp.asarray(1.0, dtype))
    return jnp.broadcast_to(mask, (has_hand.shape[0], num_frames, num_joints, 3))


# ----------------------------------------------------------------------------- #
def _smplx_loss_kernel(pm_ref, gm_ref, rj_ref, gj_ref, hand_ref, pat_ref,
                       out_ref, acc_m_ref, acc_j_ref, *,
                       tm, n_rows, d, dj, tiles_per_chunk, loss_kind,
                       hand_col0_m, hand_col0_j,
                       scale_transl, scale_rot, scale_joints):
    """One (chunk, tile) grid point.

    pm_ref, gm_ref : (tm, D)   motion tiles (native dtype, upcast here)
    rj_ref, gj_ref : (tm, Dj)  flattened joints tiles
    hand_ref       : (tm, 1)   per-row hand weight (1.0 / 0.0)
    pat_ref        : (3, Dj)   constant, pat[c, k] = 1.0 iff k % 3 == c
    out_ref        : (1, 1, 3) per-chunk (loss_transl, loss_rot, loss_joints)
                               partials, already weighted & normalized
    acc_m_ref      : (1, D)    VMEM scratch column sums (motion)
    acc_j_ref      : (1, Dj)   VMEM scratch column sums (joints)
    """
    c = pl.program_id(0)
    t = pl.program_id(1)
    g = c * tiles_per_chunk + t          # logical tile index (may overhang)

    @pl.when(t == 0)
    def _init():
        acc_m_ref[...] = jnp.zeros_like(acc_m_ref)
        acc_j_ref[...] = jnp.zeros_like(acc_j_ref)

    # Rebuild masks in-kernel from the per-row hand weight (no mask streams).
    hand_w = hand_ref[...].astype(jnp.float32)                       # (tm, 1)
    col_m = lax.broadcasted_iota(jnp.int32, (tm, d), 1)
    col_j = lax.broadcasted_iota(jnp.int32, (tm, dj), 1)
    mmask = jnp.where(col_m >= hand_col0_m, hand_w, 1.0)             # (tm, D)
    jmask = jnp.where(col_j >= hand_col0_j, hand_w, 1.0)             # (tm, Dj)

    def accumulate(mask_rows):
        pm = pm_ref[...].astype(jnp.float32)
        gm = gm_ref[...].astype(jnp.float32)
        rj = rj_ref[...].astype(jnp.float32)
        gj = gj_ref[...].astype(jnp.float32)

        # motion loss (transl columns have mask 1, rot columns hand-gated)
        l_m = _elem_loss(pm - gm, loss_kind) * mmask

        # joints loss: (rj - transl_p) - (gj - transl_g) = (rj - gj) - dt
        dt = pm[:, 0:3] - gm[:, 0:3]                                  # (tm, 3)
        # Broadcast dt to every joint's (x,y,z) column on the otherwise-idle MXU.
        dt_b = jnp.dot(dt, pat_ref[...].astype(jnp.float32),
                       preferred_element_type=jnp.float32)            # (tm, Dj)
        l_j = _elem_loss((rj - gj) - dt_b, loss_kind) * jmask

        if mask_rows:
            # Last / clamped-overhang tiles: zero rows past N (Pallas leaves
            # out-of-bounds VMEM rows as garbage).
            row = g * tm + lax.broadcasted_iota(jnp.int32, (tm, 1), 0)
            valid = row < n_rows
            l_m = jnp.where(valid, l_m, 0.0)
            l_j = jnp.where(valid, l_j, 0.0)

        acc_m_ref[...] += jnp.sum(l_m, axis=0, keepdims=True)
        acc_j_ref[...] += jnp.sum(l_j, axis=0, keepdims=True)

    fully_valid = (g + 1) * tm <= n_rows

    @pl.when(fully_valid)
    def _fast():
        accumulate(False)

    @pl.when(jnp.logical_not(fully_valid))
    def _tail():
        accumulate(True)

    # Epilogue: finish the reduction in-kernel, emit 3 weighted partials/chunk.
    @pl.when(t == tiles_per_chunk - 1)
    def _finish():
        acc_m = acc_m_ref[...]                                        # (1, D)
        acc_j = acc_j_ref[...]                                        # (1, Dj)
        lane_m = lax.broadcasted_iota(jnp.int32, (1, d), 1)
        s_t = jnp.sum(jnp.where(lane_m < 3, acc_m, 0.0)) * scale_transl
        s_r = jnp.sum(jnp.where(lane_m >= 3, acc_m, 0.0)) * scale_rot
        s_j = jnp.sum(acc_j) * scale_joints
        lane3 = lax.broadcasted_iota(jnp.int32, (1, 1, 3), 2)
        out_ref[...] = (jnp.where(lane3 == 0, s_t, 0.0)
                        + jnp.where(lane3 == 1, s_r, 0.0)
                        + jnp.where(lane3 == 2, s_j, 0.0))


class SmplxLossPallas:
    """Pallas TPU implementation of mmotion SmplxLoss.forward."""

    def __init__(self, recons_type='l1_smooth', transl=1.0, rot=1.0, joints=0.0,
                 commit=0.02, num_body_joints=22, row_tile=2048, num_chunks=2,
                 min_tiles_per_chunk=4):
        if recons_type not in ('l1', 'l2', 'l1_smooth'):
            raise NotImplementedError('{} is not implemented'.format(recons_type))
        self.recons_type = recons_type
        self.transl = transl
        self.rot = rot
        self.joints = joints
        self.commit = commit
        self.num_body_joints = num_body_joints
        self.row_tile = row_tile
        self.num_chunks = num_chunks
        self.min_tiles_per_chunk = min_tiles_per_chunk

    # --------------------------------------------------------------------- #
    def _partial_losses(self, pm, gm, rj, gj, hand_col, pat, *, d_rot_hand0):
        n, d = pm.shape
        dj = rj.shape[1]

        if n <= self.row_tile:
            tm = n                                   # block == full dim: always legal
        else:
            tm = max(8, (self.row_tile // 8) * 8)    # sublane-aligned row tile
        total_tiles = pl.cdiv(n, tm)
        # Only split into chunks (v7x megacore) when each chunk keeps its
        # double-buffered pipeline full; single-TC chips / small N run 1 chunk.
        # TODO(synk): verify the 'parallel' chunk axis actually lands on both
        # v7x TensorCores (xprof); switch to pltpu.CORE_PARALLEL if it does not.
        if total_tiles >= self.num_chunks * self.min_tiles_per_chunk:
            n_chunks = self.num_chunks
        else:
            n_chunks = 1
        n_chunks = max(1, min(n_chunks, total_tiles))
        tpc = pl.cdiv(total_tiles, n_chunks)
        last_tile = total_tiles - 1

        def tile_map(c, t):
            # Clamp the last chunk's overhang tiles back in range; their logical
            # rows are >= n and get masked out inside the kernel.
            return (jnp.minimum(c * tpc + t, last_tile), 0)

        kernel = functools.partial(
            _smplx_loss_kernel,
            tm=tm, n_rows=n, d=d, dj=dj, tiles_per_chunk=tpc,
            loss_kind=self.recons_type,
            hand_col0_m=d_rot_hand0,
            hand_col0_j=3 * self.num_body_joints,
            scale_transl=self.transl / (n * 3),
            scale_rot=self.rot / (n * (d - 3)),
            scale_joints=self.joints / (n * dj))

        out = pl.pallas_call(
            kernel,
            out_shape=jax.ShapeDtypeStruct((n_chunks, 1, 3), jnp.float32),
            grid_spec=pltpu.PrefetchScalarGridSpec(
                num_scalar_prefetch=0,
                grid=(n_chunks, tpc),
                in_specs=[
                    pl.BlockSpec((tm, d), tile_map),    # pred_motion
                    pl.BlockSpec((tm, d), tile_map),    # gt_motion
                    pl.BlockSpec((tm, dj), tile_map),   # recons_joints (flat)
                    pl.BlockSpec((tm, dj), tile_map),   # gt_joints (flat)
                    pl.BlockSpec((tm, 1), tile_map),    # per-row hand weight
                    pl.BlockSpec((3, dj), lambda c, t: (0, 0)),  # coord pattern
                ],
                out_specs=pl.BlockSpec((1, 1, 3), lambda c, t: (c, 0, 0)),
                scratch_shapes=[pltpu.VMEM((1, d), jnp.float32),
                                pltpu.VMEM((1, dj), jnp.float32)],
            ),
            compiler_params=pltpu.CompilerParams(
                dimension_semantics=("parallel", "arbitrary"),
                vmem_limit_bytes=40 * 1024 * 1024),
        )(pm, gm, rj, gj, hand_col, pat)

        return jnp.sum(out, axis=(0, 1))   # (3,) = (loss_transl, loss_rot, loss_joints)

    # --------------------------------------------------------------------- #
    def forward(self, inputs, outputs, data_samples):
        def _get(obj, name):
            return obj[name] if isinstance(obj, dict) else getattr(obj, name)

        has_hand = _get(data_samples, 'has_hand')
        rot_type = _get(data_samples, 'rot_type')
        commit_loss = outputs.get('commit_loss', None)
        pred_motion = outputs['pred_motion']
        gt_motion = inputs['motion']
        recons_joints = outputs['recons_joints']
        gt_joints = outputs['gt_joints']

        b, num_frames, d = pred_motion.shape
        j = recons_joints.shape[-2]
        n = b * num_frames
        dj = j * 3

        # TODO(synk): rot_type[0] assumes a batch-homogeneous rotation type.
        rot_dim = _ROT_DIMS[rot_type[0]]
        num_rot_joints = (d - 3) // rot_dim
        assert num_rot_joints * rot_dim == d - 3
        d_rot_hand0 = 3 + self.num_body_joints * rot_dim   # first hand rot column

        # Flatten leading dims (free reshapes); keep the native input dtype --
        # the kernel upcasts each tile to f32 on-chip (no wrapper pad/cast,
        # no materialized masks).
        pm = pred_motion.reshape(n, d)
        gm = gt_motion.reshape(n, d)
        rj = recons_joints.reshape(n, dj)
        gj = gt_joints.reshape(n, dj)
        hand_col = jnp.broadcast_to(
            has_hand.astype(jnp.float32)[:, None], (b, num_frames)).reshape(n, 1)
        # Tiny constant selecting which transl coordinate each joint column uses.
        pat = (jnp.arange(dj)[None, :] % 3 ==
               jnp.arange(3)[:, None]).astype(jnp.float32)

        partials = self._partial_losses(pm, gm, rj, gj, hand_col, pat,
                                        d_rot_hand0=d_rot_hand0)

        loss_dict = dict(loss_transl=partials[0],
                         loss_rot=partials[1],
                         loss_joints=partials[2])
        # TODO(synk): original errors on commit_loss=None; kept optional here.
        if commit_loss is not None:
            loss_dict['loss_commit'] = commit_loss * self.commit
        return loss_dict

    __call__ = forward


# --------------------------------------------------------------------------- #
def _reference_losses(mod, inputs, outputs, data_samples):
    """Pure-JAX reference of SmplxLoss.forward."""
    pred_motion = outputs['pred_motion'].astype(jnp.float32)
    gt_motion = inputs['motion'].astype(jnp.float32)
    rj = outputs['recons_joints'].astype(jnp.float32)
    gj = outputs['gt_joints'].astype(jnp.float32)
    has_hand = data_samples['has_hand']
    rot_type = data_samples['rot_type']
    _, t, d = pred_motion.shape
    j = rj.shape[-2]
    f = lambda diff: _elem_loss(diff, mod.recons_type)

    rel_p = rj - pred_motion[..., :3][..., None, :]
    rel_g = gj - gt_motion[..., :3][..., None, :]
    rot_dim = _ROT_DIMS[rot_type[0]]
    rot_mask = batch_get_mask_rotation(t, has_hand, rot_type[0],
                                       (d - 3) // rot_dim, mod.num_body_joints)
    joints_mask = batch_get_mask_joints(t, has_hand, j, mod.num_body_joints)

    loss_transl = jnp.mean(f(pred_motion[..., :3] - gt_motion[..., :3]))
    loss_rot = jnp.mean(f(pred_motion[..., 3:] - gt_motion[..., 3:]) * rot_mask)
    loss_joints = jnp.mean(f(rel_p - rel_g) * joints_mask)
    ref = dict(loss_transl=mod.transl * loss_transl,
               loss_rot=mod.rot * loss_rot,
               loss_joints=mod.joints * loss_joints)
    if outputs.get('commit_loss', None) is not None:
        ref['loss_commit'] = mod.commit * outputs['commit_loss']
    return ref


if __name__ == "__main__":
    B, T, J = 2, 47, 24                 # N = 94 rows (not a multiple of 8 -> tail masking)
    ROT_TYPE = 'rot6d'
    D = 3 + J * _ROT_DIMS[ROT_TYPE]     # 147 motion features

    key = jax.random.PRNGKey(0)
    k0, k1, k2, k3, k4 = jax.random.split(key, 5)
    pred_motion = jax.random.normal(k0, (B, T, D), dtype=jnp.float32)
    gt_motion = jax.random.normal(k1, (B, T, D), dtype=jnp.float32)
    recons_joints = jax.random.normal(k2, (B, T, J, 3), dtype=jnp.float32)
    gt_joints = jax.random.normal(k3, (B, T, J, 3), dtype=jnp.float32)
    commit_loss = jax.random.uniform(k4, (), dtype=jnp.float32)

    inputs = {'motion': gt_motion}
    outputs = {'pred_motion': pred_motion, 'recons_joints': recons_joints,
               'gt_joints': gt_joints, 'commit_loss': commit_loss}
    data_samples = {'has_hand': jnp.array([True, False]),
                    'rot_type': [ROT_TYPE, ROT_TYPE]}

    # cfg 1: single full tile (tm == N).
    # cfg 2: 12 tiles over 2 chunks (tail-row masking on the last tile).
    # cfg 3: 3 tiles over 2 chunks (exercises the clamped overhang tile).
    configs = [dict(row_tile=2048),
               dict(row_tile=8),
               dict(row_tile=40, min_tiles_per_chunk=1)]
    for cfg in configs:
        loss_mod = SmplxLossPallas(recons_type='l1_smooth', transl=1.0, rot=1.0,
                                   joints=0.5, commit=0.02, **cfg)
        got = loss_mod(inputs, outputs, data_samples)
        got = jax.tree_util.tree_map(jax.block_until_ready, got)
        ref = _reference_losses(loss_mod, inputs, outputs, data_samples)
        for name in ref:
            assert jnp.allclose(got[name], ref[name], rtol=1e-4, atol=1e-6), (
                cfg, name, got[name], ref[name])

    print("KERNEL_OK")
</pallas_src>

<mosaic_0001>
module attributes {stable_mosaic.version = 11 : i64} {
  func.func @_smplx_loss_kernel(%arg0: i32, %arg1: i32, %arg2: memref<94x147xf32, #tpu.memory_space<vmem>>, %arg3: memref<94x147xf32, #tpu.memory_space<vmem>>, %arg4: memref<94x72xf32, #tpu.memory_space<vmem>>, %arg5: memref<94x72xf32, #tpu.memory_space<vmem>>, %arg6: memref<94x1xf32, #tpu.memory_space<vmem>>, %arg7: memref<3x72xf32, #tpu.memory_space<vmem>>, %arg8: memref<1x1x3xf32, #tpu.memory_space<vmem>>, %arg9: memref<1x147xf32, #tpu.memory_space<vmem>>, %arg10: memref<1x72xf32, #tpu.memory_space<vmem>>) attributes {dimension_semantics = [#tpu.dimension_semantics<parallel>, #tpu.dimension_semantics<arbitrary>], iteration_bounds = array<i64: 1, 1>, scalar_prefetch = 0 : i64, scratch_operands = 2 : i64, tpu.core_type = #tpu.core_type<tc>, window_params = [{transform_indices = @transform_0, window_bounds = array<i64: 94, 147>}, {transform_indices = @transform_1, window_bounds = array<i64: 94, 147>}, {transform_indices = @transform_2, window_bounds = array<i64: 94, 72>}, {transform_indices = @transform_3, window_bounds = array<i64: 94, 72>}, {transform_indices = @transform_4, window_bounds = array<i64: 94, 1>}, {pipeline_mode = #tpu.pipeline_mode<synchronous>, transform_indices = @transform_5, window_bounds = array<i64: 3, 72>}, {transform_indices = @transform_6, window_bounds = array<i64: 1, 1, 3>}]} {
    %c1_i32 = arith.constant 1 : i32
    %0 = arith.muli %arg0, %c1_i32 : i32
    %1 = arith.addi %0, %arg1 : i32
    %c0_i32 = arith.constant 0 : i32
    %2 = arith.cmpi eq, %arg1, %c0_i32 : i32
    %3 = arith.extui %2 : i1 to i32
    %c0_i32_0 = arith.constant 0 : i32
    %4 = arith.cmpi ne, %3, %c0_i32_0 : i32
    scf.if %4 {
      %cst_9 = arith.constant 0.000000e+00 : f32
      %31 = vector.broadcast %cst_9 : f32 to vector<1x147xf32>
      %c0_10 = arith.constant 0 : index
      %c0_11 = arith.constant 0 : index
      %32 = vector.load %arg9[%c0_10, %c0_11] : memref<1x147xf32, #tpu.memory_space<vmem>>, vector<1x147xf32>
      tpu.vector_store %arg9[%c0_10, %c0_11], %31 {strides = array<i32>} : memref<1x147xf32, #tpu.memory_space<vmem>>, vector<1x147xf32>,
      %cst_12 = arith.constant 0.000000e+00 : f32
      %33 = vector.broadcast %cst_12 : f32 to vector<1x72xf32>
      %c0_13 = arith.constant 0 : index
      %c0_14 = arith.constant 0 : index
      %34 = vector.load %arg10[%c0_13, %c0_14] : memref<1x72xf32, #tpu.memory_space<vmem>>, vector<1x72xf32>
      tpu.vector_store %arg10[%c0_13, %c0_14], %33 {strides = array<i32>} : memref<1x72xf32, #tpu.memory_space<vmem>>, vector<1x72xf32>,
    } else {
    }
    %c0 = arith.constant 0 : index
    %c0_1 = arith.constant 0 : index
    %5 = vector.load %arg6[%c0, %c0_1] : memref<94x1xf32, #tpu.memory_space<vmem>>, vector<94x1xf32>
    %6 = tpu.iota {dimensions = array<i32: 1>} : vector<94x147xi32>
    %7 = tpu.iota {dimensions = array<i32: 1>} : vector<94x72xi32>
    %c135_i32 = arith.constant 135 : i32
    %8 = vector.broadcast %c135_i32 : i32 to vector<94x147xi32>
    %9 = arith.cmpi sge, %6, %8 : vector<94x147xi32>
    %cst = arith.constant 1.000000e+00 : f32
    %10 = vector.shape_cast %5 : vector<94x1xf32> to vector<94x1xf32>
    %11 = vector.broadcast %10 : vector<94x1xf32> to vector<94x147xf32>
    %12 = vector.broadcast %cst : f32 to vector<94x147xf32>
    %13 = arith.select %9, %11, %12 : vector<94x147xi1>, vector<94x147xf32>
    %c66_i32 = arith.constant 66 : i32
    %14 = vector.broadcast %c66_i32 : i32 to vector<94x72xi32>
    %15 = arith.cmpi sge, %7, %14 : vector<94x72xi32>
    %cst_2 = arith.constant 1.000000e+00 : f32
    %16 = vector.shape_cast %5 : vector<94x1xf32> to vector<94x1xf32>
    %17 = vector.broadcast %16 : vector<94x1xf32> to vector<94x72xf32>
    %18 = vector.broadcast %cst_2 : f32 to vector<94x72xf32>
    %19 = arith.select %15, %17, %18 : vector<94x72xi1>, vector<94x72xf32>
    %c1_i32_3 = arith.constant 1 : i32
    %20 = arith.addi %1, %c1_i32_3 : i32
    %c94_i32 = arith.constant 94 : i32
    %21 = arith.muli %20, %c94_i32 : i32
    %c94_i32_4 = arith.constant 94 : i32
    %22 = arith.cmpi sle, %21, %c94_i32_4 : i32
    %23 = arith.extui %22 : i1 to i32
    %c0_i32_5 = arith.constant 0 : i32
    %24 = arith.cmpi ne, %23, %c0_i32_5 : i32
    scf.if %24 {
      %c0_9 = arith.constant 0 : index
      %c0_10 = arith.constant 0 : index
      %31 = vector.load %arg2[%c0_9, %c0_10] : memref<94x147xf32, #tpu.memory_space<vmem>>, vector<94x147xf32>
      %c0_11 = arith.constant 0 : index
      %c0_12 = arith.constant 0 : index
      %32 = vector.load %arg3[%c0_11, %c0_12] : memref<94x147xf32, #tpu.memory_space<vmem>>, vector<94x147xf32>
      %c0_13 = arith.constant 0 : index
      %c0_14 = arith.constant 0 : index
      %33 = vector.load %arg4[%c0_13, %c0_14] : memref<94x72xf32, #tpu.memory_space<vmem>>, vector<94x72xf32>
      %c0_15 = arith.constant 0 : index
      %c0_16 = arith.constant 0 : index
      %34 = vector.load %arg5[%c0_15, %c0_16] : memref<94x72xf32, #tpu.memory_space<vmem>>, vector<94x72xf32>
      %35 = arith.subf %31, %32 : vector<94x147xf32>
      %36 = math.absf %35 : vector<94x147xf32>
      %cst_17 = arith.constant 1.000000e+00 : f32
      %37 = vector.broadcast %cst_17 : f32 to vector<94x147xf32>
      %38 = arith.cmpf olt, %36, %37 : vector<94x147xf32>
      %cst_18 = arith.constant 5.000000e-01 : f32
      %39 = vector.broadcast %cst_18 : f32 to vector<94x147xf32>
      %40 = arith.mulf %39, %35 : vector<94x147xf32>
      %41 = arith.mulf %40, %35 : vector<94x147xf32>
      %cst_19 = arith.constant 5.000000e-01 : f32
      %42 = vector.broadcast %cst_19 : f32 to vector<94x147xf32>
      %43 = arith.subf %36, %42 : vector<94x147xf32>
      %44 = arith.select %38, %41, %43 : vector<94x147xi1>, vector<94x147xf32>
      %45 = arith.mulf %44, %13 : vector<94x147xf32>
      %46 = vector.extract_strided_slice %31 {offsets = [0, 0], sizes = [94, 3], strides = [1, 1]} : vector<94x147xf32> to vector<94x3xf32>
      %47 = vector.extract_strided_slice %32 {offsets = [0, 0], sizes = [94, 3], strides = [1, 1]} : vector<94x147xf32> to vector<94x3xf32>
      %48 = arith.subf %46, %47 : vector<94x3xf32>
      %c0_20 = arith.constant 0 : index
      %c0_21 = arith.constant 0 : index
      %49 = vector.load %arg7[%c0_20, %c0_21] : memref<3x72xf32, #tpu.memory_space<vmem>>, vector<3x72xf32>
      %cst_22 = arith.constant dense<0.000000e+00> : vector<94x72xf32>
      %50 = tpu.matmul %48, %49, %cst_22 {dimension_numbers = #tpu.dot_dimension_numbers<[1], [0], [0], [1], [0, 0, 1, 1], [], []>} : vector<94x3xf32>, vector<3x72xf32>, vector<94x72xf32> -> vector<94x72xf32>
      %51 = arith.subf %33, %34 : vector<94x72xf32>
      %52 = arith.subf %51, %50 : vector<94x72xf32>
      %53 = math.absf %52 : vector<94x72xf32>
      %cst_23 = arith.constant 1.000000e+00 : f32
      %54 = vector.broadcast %cst_23 : f32 to vector<94x72xf32>
      %55 = arith.cmpf olt, %53, %54 : vector<94x72xf32>
      %cst_24 = arith.constant 5.000000e-01 : f32
      %56 = vector.broadcast %cst_24 : f32 to vector<94x72xf32>
      %57 = arith.mulf %56, %52 : vector<94x72xf32>
      %58 = arith.mulf %57, %52 : vector<94x72xf32>
      %cst_25 = arith.constant 5.000000e-01 : f32
      %59 = vector.broadcast %cst_25 : f32 to vector<94x72xf32>
      %60 = arith.subf %53, %59 : vector<94x72xf32>
      %61 = arith.select %55, %58, %60 : vector<94x72xi1>, vector<94x72xf32>
      %62 = arith.mulf %61, %19 : vector<94x72xf32>
      %c0_26 = arith.constant 0 : index
      %c0_27 = arith.constant 0 : index
      %63 = vector.load %arg9[%c0_26, %c0_27] : memref<1x147xf32, #tpu.memory_space<vmem>>, vector<1x147xf32>
      %cst_28 = arith.constant dense<0.000000e+00> : vector<147xf32>
      %64 = vector.multi_reduction <add>, %45, %cst_28 [0] : vector<94x147xf32> to vector<147xf32>
      %65 = vector.shape_cast %64 : vector<147xf32> to vector<1x147xf32>
      %66 = arith.addf %63, %65 : vector<1x147xf32>
      %c0_29 = arith.constant 0 : index
      %c0_30 = arith.constant 0 : index
      %67 = vector.load %arg9[%c0_29, %c0_30] : memref<1x147xf32, #tpu.memory_space<vmem>>, vector<1x147xf32>
      tpu.vector_store %arg9[%c0_29, %c0_30], %66 {strides = array<i32>} : memref<1x147xf32, #tpu.memory_space<vmem>>, vector<1x147xf32>,
      %c0_31 = arith.constant 0 : index
      %c0_32 = arith.constant 0 : index
      %68 = vector.load %arg10[%c0_31, %c0_32] : memref<1x72xf32, #tpu.memory_space<vmem>>, vector<1x72xf32>
      %cst_33 = arith.constant dense<0.000000e+00> : vector<72xf32>
      %69 = vector.multi_reduction <add>, %62, %cst_33 [0] : vector<94x72xf32> to vector<72xf32>
      %70 = vector.shape_cast %69 : vector<72xf32> to vector<1x72xf32>
      %71 = arith.addf %68, %70 : vector<1x72xf32>
      %c0_34 = arith.constant 0 : index
      %c0_35 = arith.constant 0 : index
      %72 = vector.load %arg10[%c0_34, %c0_35] : memref<1x72xf32, #tpu.memory_space<vmem>>, vector<1x72xf32>
      tpu.vector_store %arg10[%c0_34, %c0_35], %71 {strides = array<i32>} : memref<1x72xf32, #tpu.memory_space<vmem>>, vector<1x72xf32>,
    } else {
    }
    %true = arith.constant true
    %25 = arith.xori %22, %true : i1
    %26 = arith.extui %25 : i1 to i32
    %c0_i32_6 = arith.constant 0 : i32
    %27 = arith.cmpi ne, %26, %c0_i32_6 : i32
    scf.if %27 {
      %c0_9 = arith.constant 0 : index
      %c0_10 = arith.constant 0 : index
      %31 = vector.load %arg2[%c0_9, %c0_10] : memref<94x147xf32, #tpu.memory_space<vmem>>, vector<94x147xf32>
      %c0_11 = arith.constant 0 : index
      %c0_12 = arith.constant 0 : index
      %32 = vector.load %arg3[%c0_11, %c0_12] : memref<94x147xf32, #tpu.memory_space<vmem>>, vector<94x147xf32>
      %c0_13 = arith.constant 0 : index
      %c0_14 = arith.constant 0 : index
      %33 = vector.load %arg4[%c0_13, %c0_14] : memref<94x72xf32, #tpu.memory_space<vmem>>, vector<94x72xf32>
      %c0_15 = arith.constant 0 : index
      %c0_16 = arith.constant 0 : index
      %34 = vector.load %arg5[%c0_15, %c0_16] : memref<94x72xf32, #tpu.memory_space<vmem>>, vector<94x72xf32>
      %35 = arith.subf %31, %32 : vector<94x147xf32>
      %36 = math.absf %35 : vector<94x147xf32>
      %cst_17 = arith.constant 1.000000e+00 : f32
      %37 = vector.broadcast %cst_17 : f32 to vector<94x147xf32>
      %38 = arith.cmpf olt, %36, %37 : vector<94x147xf32>
      %cst_18 = arith.constant 5.000000e-01 : f32
      %39 = vector.broadcast %cst_18 : f32 to vector<94x147xf32>
      %40 = arith.mulf %39, %35 : vector<94x147xf32>
      %41 = arith.mulf %40, %35 : vector<94x147xf32>
      %cst_19 = arith.constant 5.000000e-01 : f32
      %42 = vector.broadcast %cst_19 : f32 to vector<94x147xf32>
      %43 = arith.subf %36, %42 : vector<94x147xf32>
      %44 = arith.select %38, %41, %43 : vector<94x147xi1>, vector<94x147xf32>
      %45 = arith.mulf %44, %13 : vector<94x147xf32>
      %46 = vector.extract_strided_slice %31 {offsets = [0, 0], sizes = [94, 3], strides = [1, 1]} : vector<94x147xf32> to vector<94x3xf32>
      %47 = vector.extract_strided_slice %32 {offsets = [0, 0], sizes = [94, 3], strides = [1, 1]} : vector<94x147xf32> to vector<94x3xf32>
      %48 = arith.subf %46, %47 : vector<94x3xf32>
      %c0_20 = arith.constant 0 : index
      %c0_21 = arith.constant 0 : index
      %49 = vector.load %arg7[%c0_20, %c0_21] : memref<3x72xf32, #tpu.memory_space<vmem>>, vector<3x72xf32>
      %cst_22 = arith.constant dense<0.000000e+00> : vector<94x72xf32>
      %50 = tpu.matmul %48, %49, %cst_22 {dimension_numbers = #tpu.dot_dimension_numbers<[1], [0], [0], [1], [0, 0, 1, 1], [], []>} : vector<94x3xf32>, vector<3x72xf32>, vector<94x72xf32> -> vector<94x72xf32>
      %51 = arith.subf %33, %34 : vector<94x72xf32>
      %52 = arith.subf %51, %50 : vector<94x72xf32>
      %53 = math.absf %52 : vector<94x72xf32>
      %cst_23 = arith.constant 1.000000e+00 : f32
      %54 = vector.broadcast %cst_23 : f32 to vector<94x72xf32>
      %55 = arith.cmpf olt, %53, %54 : vector<94x72xf32>
      %cst_24 = arith.constant 5.000000e-01 : f32
      %56 = vector.broadcast %cst_24 : f32 to vector<94x72xf32>
      %57 = arith.mulf %56, %52 : vector<94x72xf32>
      %58 = arith.mulf %57, %52 : vector<94x72xf32>
      %cst_25 = arith.constant 5.000000e-01 : f32
      %59 = vector.broadcast %cst_25 : f32 to vector<94x72xf32>
      %60 = arith.subf %53, %59 : vector<94x72xf32>
      %61 = arith.select %55, %58, %60 : vector<94x72xi1>, vector<94x72xf32>
      %62 = arith.mulf %61, %19 : vector<94x72xf32>
      %c94_i32_26 = arith.constant 94 : i32
      %63 = arith.muli %1, %c94_i32_26 : i32
      %64 = tpu.iota {dimensions = array<i32: 0>} : vector<94x1xi32>
      %65 = vector.broadcast %63 : i32 to vector<94x1xi32>
      %66 = arith.addi %65, %64 : vector<94x1xi32>
      %c94_i32_27 = arith.constant 94 : i32
      %67 = vector.broadcast %c94_i32_27 : i32 to vector<94x1xi32>
      %68 = arith.cmpi slt, %66, %67 : vector<94x1xi32>
      %cst_28 = arith.constant 0.000000e+00 : f32
      %69 = vector.shape_cast %68 : vector<94x1xi1> to vector<94x1xi1>
      %70 = vector.broadcast %69 : vector<94x1xi1> to vector<94x147xi1>
      %71 = vector.broadcast %cst_28 : f32 to vector<94x147xf32>
      %72 = arith.select %70, %45, %71 : vector<94x147xi1>, vector<94x147xf32>
      %cst_29 = arith.constant 0.000000e+00 : f32
      %73 = vector.shape_cast %68 : vector<94x1xi1> to vector<94x1xi1>
      %74 = vector.broadcast %73 : vector<94x1xi1> to vector<94x72xi1>
      %75 = vector.broadcast %cst_29 : f32 to vector<94x72xf32>
      %76 = arith.select %74, %62, %75 : vector<94x72xi1>, vector<94x72xf32>
      %c0_30 = arith.constant 0 : index
      %c0_31 = arith.constant 0 : index
      %77 = vector.load %arg9[%c0_30, %c0_31] : memref<1x147xf32, #tpu.memory_space<vmem>>, vector<1x147xf32>
      %cst_32 = arith.constant dense<0.000000e+00> : vector<147xf32>
      %78 = vector.multi_reduction <add>, %72, %cst_32 [0] : vector<94x147xf32> to vector<147xf32>
      %79 = vector.shape_cast %78 : vector<147xf32> to vector<1x147xf32>
      %80 = arith.addf %77, %79 : vector<1x147xf32>
      %c0_33 = arith.constant 0 : index
      %c0_34 = arith.constant 0 : index
      %81 = vector.load %arg9[%c0_33, %c0_34] : memref<1x147xf32, #tpu.memory_space<vmem>>, vector<1x147xf32>
      tpu.vector_store %arg9[%c0_33, %c0_34], %80 {strides = array<i32>} : memref<1x147xf32, #tpu.memory_space<vmem>>, vector<1x147xf32>,
      %c0_35 = arith.constant 0 : index
      %c0_36 = arith.constant 0 : index
      %82 = vector.load %arg10[%c0_35, %c0_36] : memref<1x72xf32, #tpu.memory_space<vmem>>, vector<1x72xf32>
      %cst_37 = arith.constant dense<0.000000e+00> : vector<72xf32>
      %83 = vector.multi_reduction <add>, %76, %cst_37 [0] : vector<94x72xf32> to vector<72xf32>
      %84 = vector.shape_cast %83 : vector<72xf32> to vector<1x72xf32>
      %85 = arith.addf %82, %84 : vector<1x72xf32>
      %c0_38 = arith.constant 0 : index
      %c0_39 = arith.constant 0 : index
      %86 = vector.load %arg10[%c0_38, %c0_39] : memref<1x72xf32, #tpu.memory_space<vmem>>, vector<1x72xf32>
      tpu.vector_store %arg10[%c0_38, %c0_39], %85 {strides = array<i32>} : memref<1x72xf32, #tpu.memory_space<vmem>>, vector<1x72xf32>,
    } else {
    }
    %c0_i32_7 = arith.constant 0 : i32
    %28 = arith.cmpi eq, %arg1, %c0_i32_7 : i32
    %29 = arith.extui %28 : i1 to i32
    %c0_i32_8 = arith.constant 0 : i32
    %30 = arith.cmpi ne, %29, %c0_i32_8 : i32
    scf.if %30 {
      %c0_9 = arith.constant 0 : index
      %c0_10 = arith.constant 0 : index
      %31 = vector.load %arg9[%c0_9, %c0_10] : memref<1x147xf32, #tpu.memory_space<vmem>>, vector<1x147xf32>
      %c0_11 = arith.constant 0 : index
      %c0_12 = arith.constant 0 : index
      %32 = vector.load %arg10[%c0_11, %c0_12] : memref<1x72xf32, #tpu.memory_space<vmem>>, vector<1x72xf32>
      %33 = tpu.iota {dimensions = array<i32: 1>} : vector<1x147xi32>
      %c3_i32 = arith.constant 3 : i32
      %34 = vector.broadcast %c3_i32 : i32 to vector<1x147xi32>
      %35 = arith.cmpi slt, %33, %34 : vector<1x147xi32>
      %cst_13 = arith.constant 0.000000e+00 : f32
      %36 = vector.broadcast %cst_13 : f32 to vector<1x147xf32>
      %37 = arith.select %35, %31, %36 : vector<1x147xi1>, vector<1x147xf32>
      %38 = vector.shape_cast %37 : vector<1x147xf32> to vector<1x1x147xf32>
      %cst_14 = arith.constant dense<0.000000e+00> : vector<1xf32>
      %39 = vector.multi_reduction <add>, %38, %cst_14 [1, 2] : vector<1x1x147xf32> to vector<1xf32>
      %40 = vector.shape_cast %39 : vector<1xf32> to vector<1x1x1xf32>
      %41 = vector.extract %40[0, 0, 0] : f32 from vector<1x1x1xf32>
      %cst_15 = arith.constant 0.00354609918 : f32
      %42 = arith.mulf %41, %cst_15 : f32
      %c3_i32_16 = arith.constant 3 : i32
      %43 = vector.broadcast %c3_i32_16 : i32 to vector<1x147xi32>
      %44 = arith.cmpi sge, %33, %43 : vector<1x147xi32>
      %cst_17 = arith.constant 0.000000e+00 : f32
      %45 = vector.broadcast %cst_17 : f32 to vector<1x147xf32>
      %46 = arith.select %44, %31, %45 : vector<1x147xi1>, vector<1x147xf32>
      %47 = vector.shape_cast %46 : vector<1x147xf32> to vector<1x1x147xf32>
      %cst_18 = arith.constant dense<0.000000e+00> : vector<1xf32>
      %48 = vector.multi_reduction <add>, %47, %cst_18 [1, 2] : vector<1x1x147xf32> to vector<1xf32>
      %49 = vector.shape_cast %48 : vector<1xf32> to vector<1x1x1xf32>
      %50 = vector.extract %49[0, 0, 0] : f32 from vector<1x1x1xf32>
      %cst_19 = arith.constant 7.38770686E-5 : f32
      %51 = arith.mulf %50, %cst_19 : f32
      %52 = vector.shape_cast %32 : vector<1x72xf32> to vector<1x1x72xf32>
      %cst_20 = arith.constant dense<0.000000e+00> : vector<1xf32>
      %53 = vector.multi_reduction <add>, %52, %cst_20 [1, 2] : vector<1x1x72xf32> to vector<1xf32>
      %54 = vector.shape_cast %53 : vector<1xf32> to vector<1x1x1xf32>
      %55 = vector.extract %54[0, 0, 0] : f32 from vector<1x1x1xf32>
      %cst_21 = arith.constant 7.38770686E-5 : f32
      %56 = arith.mulf %55, %cst_21 : f32
      %57 = tpu.iota {dimensions = array<i32: 2>} : vector<1x1x3xi32>
      %c0_i32_22 = arith.constant 0 : i32
      %58 = vector.broadcast %c0_i32_22 : i32 to vector<1x1x3xi32>
      %59 = arith.cmpi eq, %57, %58 : vector<1x1x3xi32>
      %cst_23 = arith.constant 0.000000e+00 : f32
      %60 = vector.broadcast %42 : f32 to vector<1x1x3xf32>
      %61 = vector.broadcast %cst_23 : f32 to vector<1x1x3xf32>
      %62 = arith.select %59, %60, %61 : vector<1x1x3xi1>, vector<1x1x3xf32>
      %c1_i32_24 = arith.constant 1 : i32
      %63 = vector.broadcast %c1_i32_24 : i32 to vector<1x1x3xi32>
      %64 = arith.cmpi eq, %57, %63 : vector<1x1x3xi32>
      %cst_25 = arith.constant 0.000000e+00 : f32
      %65 = vector.broadcast %51 : f32 to vector<1x1x3xf32>
      %66 = vector.broadcast %cst_25 : f32 to vector<1x1x3xf32>
      %67 = arith.select %64, %65, %66 : vector<1x1x3xi1>, vector<1x1x3xf32>
      %68 = arith.addf %62, %67 : vector<1x1x3xf32>
      %c2_i32 = arith.constant 2 : i32
      %69 = vector.broadcast %c2_i32 : i32 to vector<1x1x3xi32>
      %70 = arith.cmpi eq, %57, %69 : vector<1x1x3xi32>
      %cst_26 = arith.constant 0.000000e+00 : f32
      %71 = vector.broadcast %56 : f32 to vector<1x1x3xf32>
      %72 = vector.broadcast %cst_26 : f32 to vector<1x1x3xf32>
      %73 = arith.select %70, %71, %72 : vector<1x1x3xi1>, vector<1x1x3xf32>
      %74 = arith.addf %68, %73 : vector<1x1x3xf32>
      %c0_27 = arith.constant 0 : index
      %c0_28 = arith.constant 0 : index
      %c0_29 = arith.constant 0 : index
      %75 = vector.load %arg8[%c0_27, %c0_28, %c0_29] : memref<1x1x3xf32, #tpu.memory_space<vmem>>, vector<1x1x3xf32>
      tpu.vector_store %arg8[%c0_27, %c0_28, %c0_29], %74 {strides = array<i32>} : memref<1x1x3xf32, #tpu.memory_space<vmem>>, vector<1x1x3xf32>,
    } else {
    }
    return
  }
  func.func @transform_0(%arg0: i32, %arg1: i32) -> (i32, i32) {
    %c1_i32 = arith.constant 1 : i32
    %0 = arith.muli %arg0, %c1_i32 : i32
    %1 = arith.addi %0, %arg1 : i32
    %c0_i32 = arith.constant 0 : i32
    %2 = arith.minsi %1, %c0_i32 : i32
    %c0_i32_0 = arith.constant 0 : i32
    %c0_i32_1 = arith.constant 0 : i32
    return %2, %c0_i32_0 : i32, i32
  }
  func.func @transform_1(%arg0: i32, %arg1: i32) -> (i32, i32) {
    %c1_i32 = arith.constant 1 : i32
    %0 = arith.muli %arg0, %c1_i32 : i32
    %1 = arith.addi %0, %arg1 : i32
    %c0_i32 = arith.constant 0 : i32
    %2 = arith.minsi %1, %c0_i32 : i32
    %c0_i32_0 = arith.constant 0 : i32
    %c0_i32_1 = arith.constant 0 : i32
    return %2, %c0_i32_0 : i32, i32
  }
  func.func @transform_2(%arg0: i32, %arg1: i32) -> (i32, i32) {
    %c1_i32 = arith.constant 1 : i32
    %0 = arith.muli %arg0, %c1_i32 : i32
    %1 = arith.addi %0, %arg1 : i32
    %c0_i32 = arith.constant 0 : i32
    %2 = arith.minsi %1, %c0_i32 : i32
    %c0_i32_0 = arith.constant 0 : i32
    %c0_i32_1 = arith.constant 0 : i32
    return %2, %c0_i32_0 : i32, i32
  }
  func.func @transform_3(%arg0: i32, %arg1: i32) -> (i32, i32) {
    %c1_i32 = arith.constant 1 : i32
    %0 = arith.muli %arg0, %c1_i32 : i32
    %1 = arith.addi %0, %arg1 : i32
    %c0_i32 = arith.constant 0 : i32
    %2 = arith.minsi %1, %c0_i32 : i32
    %c0_i32_0 = arith.constant 0 : i32
    %c0_i32_1 = arith.constant 0 : i32
    return %2, %c0_i32_0 : i32, i32
  }
  func.func @transform_4(%arg0: i32, %arg1: i32) -> (i32, i32) {
    %c1_i32 = arith.constant 1 : i32
    %0 = arith.muli %arg0, %c1_i32 : i32
    %1 = arith.addi %0, %arg1 : i32
    %c0_i32 = arith.constant 0 : i32
    %2 = arith.minsi %1, %c0_i32 : i32
    %c0_i32_0 = arith.constant 0 : i32
    %c0_i32_1 = arith.constant 0 : i32
    return %2, %c0_i32_0 : i32, i32
  }
  func.func @transform_5(%arg0: i32, %arg1: i32) -> (i32, i32) {
    %c0_i32 = arith.constant 0 : i32
    %c0_i32_0 = arith.constant 0 : i32
    %c0_i32_1 = arith.constant 0 : i32
    return %c0_i32, %c0_i32_0 : i32, i32
  }
  func.func @transform_6(%arg0: i32, %arg1: i32) -> (i32, i32, i32) {
    %c0_i32 = arith.constant 0 : i32
    %c0_i32_0 = arith.constant 0 : i32
    %c0_i32_1 = arith.constant 0 : i32
    return %arg0, %c0_i32, %c0_i32_0 : i32, i32, i32
  }
}

</mosaic_0001>

<bundles_post_ra>
// kernel: tpu_custom_call.1
= control target key start
LH: loop header
LB: loop body
LE: loop exit
PB: predicated region body
PF: predicated region fallthrough
CT: control target
= control target key end

     0   :  { %vm624_vm0 = vcmask 1042432   ;;  %v1811_v3 = vmov 0   ;;  %vm587_vm1 = vcmask 23552   ;;  %s2783_s0 = inlined_call_operand.vmem [shape: f32[94,147], index: 0, kind: input, shape index: {}]   ;;  %s2784_s1 = inlined_call_operand.vmem [shape: f32[94,147], index: 1, kind: input, shape index: {}]   ;;  %s2785_s2 = inlined_call_operand.vmem [shape: f32[94,72], index: 2, kind: input, shape index: {}]   ;;  %s2786_s3 = inlined_call_operand.vmem [shape: f32[94,72], index: 3, kind: input, shape index: {}]   ;;  %s2787_s4 = inlined_call_operand.vmem [shape: f32[94,1], index: 4, kind: input, shape index: {}]   ;;  %s2788_s5 = inlined_call_operand.vmem [shape: f32[3,72], index: 5, kind: input, shape index: {}]   ;;  %s2789_s6 = inlined_call_operand.hbm [shape: f32[1,1,3], index: 6, kind: output, shape index: {}]  }
   0x1   :  { %v586_v0 = vld [vmem:[%s2788_s5] sm:$0x7]  ;;  %v204_v1 = vld [vmem:[%s2787_s4 + $0x10] sm:$0xff]  ;;  %1783 = vset.pattern.permute.xlu1 %v1811_v3  ;;  %1782 = vset.pattern.permute.xlu0 %v1811_v3  ;;  %v205_v28 = vld [vmem:[%s2787_s4 + $0x18] sm:$0xff] }
   0x2   :  { %v202_v2 = vld [vmem:[%s2787_s4] sm:$0xff]  ;;  %v328_v6 = vld [vmem:[%s2783_s0 + $0x30] sm:$0xff]  ;;  %1696 = vmatpush.msk.msra.mxu0 %vm624_vm0, %v586_v0  ;;  %1770 = vmatpush.msk.msra.mxu1 %vm624_vm0, %v586_v0  ;;  %v203_v29 = vld [vmem:[%s2787_s4 + $0x8] sm:$0xff] }
   0x3   :  { %v322_v4 = vld [vmem:[%s2783_s0] sm:$0xff]  ;;  %v352_v8 = vld [vmem:[%s2784_s1 + $0x30] sm:$0xff]  ;;  %1771 = vmatpush.msk.msra.mxu2 %vm624_vm0, %v586_v0  ;;  %1772 = vmatpush.msk.msra.mxu3 %vm624_vm0, %v586_v0 }
   0x4   :  { %v346_v5 = vld [vmem:[%s2784_s1] sm:$0xff]  ;;  %v1880_v11 = vsub.f32 %v328_v6, %v352_v8  ;;  %v340_v13 = vld [vmem:[%s2783_s0 + $0x90] sm:$0xff]  ;;  %231 = vperm.xlu1 %1783, %v204_v1   ;;  %221 = vperm.xlu0 %1782, %v202_v2  }
   0x5   :  { %v394_v7 = vsub.f32 %v322_v4, %v346_v5  ;;  %v334_v9 = vld [vmem:[%s2783_s0 + $0x60] sm:$0xff]  ;;  %v364_v14 = vld [vmem:[%s2784_s1 + $0x90] sm:$0xff]  ;;  %1784 = vset.pattern.permute.xlu2 %v1811_v3 }
   0x6   :  { %v358_v10 = vld [vmem:[%s2784_s1 + $0x60] sm:$0xff]  ;;  %v1890_v15 = vsub.f32 %v340_v13, %v364_v14  ;;  %1700 = vmatmul.msk.f32.vlgmr.msra.gmra.mxu1 %vm587_vm1, %v1880_v11  ;;  %v324_v18 = vld [vmem:[%s2783_s0 + $0x10] sm:$0xff]  ;;  %v424_v39 = vand.u32 2147483647, %v1880_v11  ;;  %v472_v40 = vmul.f32 0.5, %v1880_v11 }
   0x7   :  { %v1882_v12 = vsub.f32 %v334_v9, %v358_v10  ;;  %v418_v16 = vand.u32 2147483647, %v394_v7  ;;  %v466_v17 = vmul.f32 0.5, %v394_v7  ;;  %1697 = vmatmul.msk.f32.vlgmr.msra.gmra.mxu0 %vm587_vm1, %v394_v7  ;;  %v348_v19 = vld [vmem:[%s2784_s1 + $0x10] sm:$0xff]  ;;  %v330_v20 = vld [vmem:[%s2783_s0 + $0x40] sm:$0xff] }
   0x8   :  { %1706 = vmatmul.msk.f32.vlgmr.msra.gmra.mxu3 %vm587_vm1, %v1890_v15  ;;  %v354_v21 = vld [vmem:[%s2784_s1 + $0x40] sm:$0xff]  ;;  %v336_v22 = vld [vmem:[%s2783_s0 + $0x70] sm:$0xff]  ;;  %v396_v30 = vsub.f32 %v324_v18, %v348_v19 }
   0x9   :  { %1703 = vmatmul.msk.f32.vlgmr.msra.gmra.mxu2 %vm587_vm1, %v1882_v12  ;;  %v360_v23 = vld [vmem:[%s2784_s1 + $0x70] sm:$0xff]  ;;  %v342_v24 = vld [vmem:[%s2783_s0 + $0xa0] sm:$0xff]  ;;  %v490_v26 = vmul.f32 %v466_v17, %v394_v7  ;;  %v1672_v27 = vadd.f32 -0.5, %v418_v16  ;;  %vm1929_vm2 = vcmp.lt.f32.partialorder %v418_v16, 1.0  ;;  %v402_v32 = vsub.f32 %v330_v20, %v354_v21 }
   0xa   :  { %v366_v25 = vld [vmem:[%s2784_s1 + $0xa0] sm:$0xff]  ;;  %v1933_v33 = vsub.f32 %v336_v22, %v360_v23  ;;  %v420_v35 = vand.u32 2147483647, %v396_v30  ;;  %v468_v36 = vmul.f32 0.5, %v396_v30  ;;  %v430_v46 = vand.u32 2147483647, %v1882_v12 }
   0xb   :  { %v1935_v34 = vsub.f32 %v342_v24, %v366_v25  ;;  %v326_v37 = vld [vmem:[%s2783_s0 + $0x20] sm:$0xff]  ;;  %v538_v42 = vsel %vm1929_vm2, %v490_v26, %v1672_v27  ;;  %v478_v47 = vmul.f32 0.5, %v1882_v12  ;;  %v474_v48 = vmul.f32 0.5, %v402_v32  ;;  %v332_v50 = vld [vmem:[%s2783_s0 + $0x50] sm:$0xff] }
   0xc   :  { %v350_v38 = vld [vmem:[%s2784_s1 + $0x20] sm:$0xff]  ;;  %236 = vperm.xlu1 %1783, %v205_v28   ;;  %226 = vperm.xlu0 %1782, %v203_v29   ;;  %vm1950_vm3 = vcmp.lt.f32.partialorder %v420_v35, 1.0  ;;  %v492_v44 = vmul.f32 %v468_v36, %v396_v30  ;;  %v1674_v45 = vadd.f32 -0.5, %v420_v35  ;;  %v356_v51 = vld [vmem:[%s2784_s1 + $0x50] sm:$0xff]  ;;  %v426_v53 = vand.u32 2147483647, %v402_v32 }
   0xd   :  { %v206_v41 = vld [vmem:[%s2787_s4 + $0x20] sm:$0xff]  ;;  %v398_v49 = vsub.f32 %v326_v37, %v350_v38  ;;  %v344_v56 = vld [vmem:[%s2783_s0 + $0xb0] sm:$0x3f] }
   0xe   :  { %1701 = vmatmul.msk.f32.gmra.mxu1 %vm587_vm1, %v402_v32  ;;  %v540_v52 = vsel %vm1950_vm3, %v492_v44, %v1674_v45  ;;  %v338_v54 = vld [vmem:[%s2783_s0 + $0x80] sm:$0xff]  ;;  %241 = vperm.xlu2 %1784, %v206_v41   ;;  %v368_v59 = vld [vmem:[%s2784_s1 + $0xb0] sm:$0x3f] }
   0xf   :  { %1698 = vmatmul.msk.f32.gmra.mxu0 %vm587_vm1, %v396_v30  ;;  %v362_v55 = vld [vmem:[%s2784_s1 + $0x80] sm:$0xff]  ;;  %v790_v57 = vadd.f32 %v540_v52, %v538_v42  ;;  %v422_v58 = vand.u32 2147483647, %v398_v49 }
  0x10   :  { %1707 = vmatmul.msk.f32.gmra.mxu3 %vm587_vm1, %v1935_v34 }
  0x11   :  { %1704 = vmatmul.msk.f32.gmra.mxu2 %vm587_vm1, %v1933_v33 }
  0x12   :  { %11 = vsyncpa [#allocation5], 0  ;;  %vm1982_vm4 = vcmp.lt.f32.partialorder %v424_v39, 1.0  ;;  %v496_v61 = vmul.f32 %v472_v40, %v1880_v11  ;;  %v1678_v62 = vadd.f32 -0.5, %v424_v39  ;;  %v209_v63 = vld [vmem:[%s2787_s4 + $0x38] sm:$0xff]  ;;  %v208_v0 = vld [vmem:[%s2787_s4 + $0x30] sm:$0xff]  ;;  %v498_v2 = vmul.f32 %v474_v48, %v402_v32 }
  0x13   :  { %v470_v1 = vmul.f32 0.5, %v398_v49  ;;  %vm1993_vm5 = vcmp.lt.f32.partialorder %v422_v58, 1.0  ;;  %v1676_v4 = vadd.f32 -0.5, %v422_v58  ;;  %v404_v5 = vsub.f32 %v332_v50, %v356_v51  ;;  %v207_v16 = vld [vmem:[%s2787_s4 + $0x28] sm:$0xff]  ;;  %v212_v35 = vld [vmem:[%s2787_s4 + $0x50] sm:$0xff]  ;;  %v210_v41 = vld [vmem:[%s2787_s4 + $0x40] sm:$0xff] }
  0x14   :  { %v1680_v6 = vadd.f32 -0.5, %v426_v53  ;;  %v410_v8 = vsub.f32 %v338_v54, %v362_v55  ;;  %v1997_v9 = vsub.f32 %v344_v56, %v368_v59  ;;  %v502_v10 = vmul.f32 %v478_v47, %v1882_v12  ;;  %256 = vperm.xlu1 %1783, %v209_v63   ;;  %251 = vperm.xlu0 %1782, %v208_v0   ;;  %v211_v36 = vld [vmem:[%s2787_s4 + $0x48] sm:$0xff]  ;;  %v213_v47 = vld [vmem:[%s2787_s4 + $0x58] sm:$0x3f]  ;;  %s1813_s12 = smov [#allocation4]   ;;  %s1633_s16 = sshll.u32 %s2789_s6, 4  ;;  %s1634_s16 = int_to_ptr.hbm [resolvable:$true] %s1633_s16 }
  0x15   :  { %v494_v7 = vmul.f32 %v470_v1, %v398_v49  ;;  %vm2000_vm6 = vcmp.lt.f32.partialorder %v426_v53, 1.0  ;;  %v428_v13 = vand.u32 2147483647, %v404_v5  ;;  %v476_v14 = vmul.f32 0.5, %v404_v5  ;;  %v331_v48 = vld [vmem:[%s2783_s0 + $0x48] sm:$0xff]  ;;  %v333_v1 = vld [vmem:[%s2783_s0 + $0x58] sm:$0xff] }
  0x16   :  { %v544_v17 = vsel %vm1982_vm4, %v496_v61, %v1678_v62  ;;  %v432_v18 = vand.u32 2147483647, %v1933_v33  ;;  %v480_v19 = vmul.f32 0.5, %v1933_v33  ;;  %1702 = vmatmul.msk.f32.gmra.mxu1 %vm587_vm1, %v404_v5  ;;  %v1684_v24 = vadd.f32 -0.5, %v430_v46  ;;  %246 = vperm.xlu2 %1784, %v207_v16   ;;  %v327_v52 = vld [vmem:[%s2783_s0 + $0x28] sm:$0xff]  ;;  %v361_v21 = vld [vmem:[%s2784_s1 + $0x78] sm:$0xff] }
  0x17   :  { %v542_v12 = vsel %vm1993_vm5, %v494_v7, %v1676_v4  ;;  %1699 = vmatmul.msk.f32.gmra.mxu0 %vm587_vm1, %v398_v49  ;;  %vm2015_vm7 = vcmp.lt.f32.partialorder %v428_v13, 1.0  ;;  %v500_v22 = vmul.f32 %v476_v14, %v404_v5  ;;  %v1682_v23 = vadd.f32 -0.5, %v428_v13  ;;  %v355_v49 = vld [vmem:[%s2784_s1 + $0x48] sm:$0xff]  ;;  %v353_v7 = vld [vmem:[%s2784_s1 + $0x38] sm:$0xff]  ;;  %s1631_s13 = sshll.u32 %s1813_s12, 4  ;;  %s1632_s13 = int_to_ptr.vmem [resolvable:$true] %s1631_s13 }
  0x18   :  { %v791_v20 = vadd.f32 %v790_v57, %v542_v12  ;;  %1708 = vmatmul.msk.f32.gmra.mxu3 %vm587_vm1, %v1997_v9  ;;  %v546_v25 = vsel %vm2000_vm6, %v498_v2, %v1680_v6  ;;  %v434_v26 = vand.u32 2147483647, %v410_v8  ;;  %v482_v27 = vmul.f32 0.5, %v410_v8  ;;  %v351_v53 = vld [vmem:[%s2784_s1 + $0x28] sm:$0xff]  ;;  %v357_v2 = vld [vmem:[%s2784_s1 + $0x58] sm:$0xff] }
  0x19   :  { %1705 = vmatmul.msk.f32.gmra.mxu2 %vm587_vm1, %v410_v8  ;;  %vm2024_vm8 = vcmp.lt.f32.partialorder %v430_v46, 1.0  ;;  %v504_v30 = vmul.f32 %v480_v19, %v1933_v33  ;;  %v1686_v31 = vadd.f32 -0.5, %v432_v18  ;;  %v548_v32 = vsel %vm2015_vm7, %v500_v22, %v1682_v23  ;;  %v323_v62 = vld [vmem:[%s2783_s0 + $0x8] sm:$0xff]  ;;  %v329_v6 = vld [vmem:[%s2783_s0 + $0x38] sm:$0xff] }
  0x1a   :  { %v792_v29 = vadd.f32 %v791_v20, %v544_v17  ;;  %vm456_vm9 = vcmp.lt.f32.partialorder %v432_v18, 1.0  ;;  %v550_v38 = vsel %vm2024_vm8, %v502_v10, %v1684_v24  ;;  %v506_v39 = vmul.f32 %v482_v27, %v410_v8  ;;  %v347_v63 = vld [vmem:[%s2784_s1 + $0x8] sm:$0xff]  ;;  %v325_v13 = vld [vmem:[%s2783_s0 + $0x18] sm:$0xff] }
  0x1b   :  { %v1688_v40 = vadd.f32 -0.5, %v434_v26  ;;  %vm458_vm10 = vcmp.lt.f32.partialorder %v434_v26, 1.0  ;;  %v552_v42 = vsel %vm456_vm9, %v504_v30, %v1686_v31  ;;  %v436_v50 = vand.u32 2147483647, %v1890_v15  ;;  %v349_v14 = vld [vmem:[%s2784_s1 + $0x18] sm:$0xff] }
  0x1c   :  { %v793_v37 = vadd.f32 %v792_v29, %v546_v25  ;;  %271 = vperm.xlu1 %1783, %v212_v35   ;;  %266 = vperm.xlu0 %1782, %v211_v36   ;;  %v484_v51 = vmul.f32 0.5, %v1890_v15  ;;  %v403_v54 = vsub.f32 %v331_v48, %v355_v49  ;;  %v2790_v55 = vlaneseq  ;;  %v337_v20 = vld [vmem:[%s2783_s0 + $0x78] sm:$0xff]  ;;  %v339_v35 = vld [vmem:[%s2783_s0 + $0x88] sm:$0xff] }
  0x1d   :  { %v554_v44 = vsel %vm458_vm10, %v506_v39, %v1688_v40  ;;  %v399_v56 = vsub.f32 %v327_v52, %v351_v53  ;;  %v2064_v58 = vadd.f32 -0.5, %v436_v50  ;;  %vm2066_vm11 = vcmp.lt.f32.partialorder %v436_v50, 1.0  ;;  %v363_v36 = vld [vmem:[%s2784_s1 + $0x88] sm:$0xff] }
  0x1e   :  { %v794_v33 = vadd.f32 %v793_v37, %v548_v32  ;;  %261 = vperm.xlu2 %1784, %v210_v41   ;;  %v2062_v57 = vmul.f32 %v484_v51, %v1890_v15  ;;  %v427_v60 = vand.u32 2147483647, %v403_v54  ;;  %v475_v61 = vmul.f32 0.5, %v403_v54  ;;  %v335_v41 = vld [vmem:[%s2783_s0 + $0x68] sm:$0xff] }
  0x1f   :  { %v438_v0 = vand.u32 2147483647, %v1935_v34  ;;  %v2078_v15 = vand.u32 127, %v2790_v55  ;;  %v486_v3 = vmul.f32 0.5, %v1935_v34  ;;  %v423_v4 = vand.u32 2147483647, %v399_v56 }
  0x20   :  { %v795_v43 = vadd.f32 %v794_v33, %v550_v38  ;;  %v471_v5 = vmul.f32 0.5, %v399_v56  ;;  %v556_v8 = vsel %vm2066_vm11, %v2062_v57, %v2064_v58  ;;  %v2791_v10 = vand.u32 2147483647, %v1997_v9 }
  0x21   :  { %v395_v11 = vsub.f32 %v323_v62, %v347_v63  ;;  %v488_v16 = vmul.f32 0.5, %v1997_v9  ;;  %v2105_v17 = vmul.f32 %v475_v61, %v403_v54  ;;  %v2107_v18 = vadd.f32 -0.5, %v427_v60 }
  0x22   :  { %v796_v45 = vadd.f32 %v795_v43, %v552_v42  ;;  %v405_v12 = vsub.f32 %v333_v1, %v357_v2  ;;  %v2119_v22 = vadd.f32 -0.5, %v438_v0  ;;  %vm2121_vm12 = vcmp.lt.f32.partialorder %v427_v60, 1.0  ;;  %v359_v42 = vld [vmem:[%s2784_s1 + $0x68] sm:$0xff] }
  0x23   :  { %v2126_v24 = vadd.s32 128, %v2078_v15  ;;  %v401_v25 = vsub.f32 %v329_v6, %v353_v7  ;;  %v2129_v26 = vmul.f32 %v486_v3, %v1935_v34  ;;  %v2131_v27 = vmul.f32 %v471_v5, %v399_v56  ;;  %v345_v5 = vld [vmem:[%s2783_s0 + $0xb8] sm:$0x3f]  ;;  %v2313_v2 = vld [vmem:[%s2786_s3 + $0x48] sm:$0xff] }
  0x24   :  { %v2042_v46 = vadd.f32 %v796_v45, %v554_v44  ;;  %v2133_v28 = vadd.f32 -0.5, %v423_v4  ;;  %v397_v29 = vsub.f32 %v325_v13, %v349_v14  ;;  %v2137_v30 = vadd.f32 -0.5, %v2791_v10  ;;  %v369_v6 = vld [vmem:[%s2784_s1 + $0xb8] sm:$0x3f] }
  0x25   :  { %vm2139_vm13 = vcmp.lt.f32.partialorder %v423_v4, 1.0  ;;  %v419_v32 = vand.u32 2147483647, %v395_v11  ;;  %v409_v37 = vsub.f32 %v337_v20, %v361_v21  ;;  %v2150_v38 = vmul.f32 %v488_v16, %v1997_v9  ;;  %v2207_v16 = vld [vmem:[%s2785_s2] sm:$0xff]  ;;  %v2226_v20 = vld [vmem:[%s2786_s3 + $0x18] sm:$0xff] }
  0x26   :  { %276 = vperm.xlu2 %1784, %v213_v47   ;;  %v547_v39 = vsel %vm2121_vm12, %v2105_v17, %v2107_v18  ;;  %v467_v40 = vmul.f32 0.5, %v395_v11  ;;  %v429_v33 = vand.u32 2147483647, %v405_v12  ;;  %vm218_vm14 = vcmp.ge.s32.totalorder %v2126_v24, 135  ;;  %v2212_v17 = vld [vmem:[%s2786_s3] sm:$0xff] }
  0x27   :  { %v477_v43 = vmul.f32 0.5, %v405_v12  ;;  %v425_v44 = vand.u32 2147483647, %v401_v25  ;;  %v473_v45 = vmul.f32 0.5, %v401_v25  ;;  %v543_v47 = vsel %vm2139_vm13, %v2131_v27, %v2133_v28 }
  0x28   :  { %v421_v48 = vand.u32 2147483647, %v397_v29  ;;  %v469_v49 = vmul.f32 0.5, %v397_v29  ;;  %v411_v50 = vsub.f32 %v339_v35, %v363_v36  ;;  %vm2167_vm15 = vcmp.lt.f32.partialorder %v419_v32, 1.0 }
  0x29   :  { %v433_v52 = vand.u32 2147483647, %v409_v37  ;;  %v481_v53 = vmul.f32 0.5, %v409_v37  ;;  %v407_v54 = vsub.f32 %v335_v41, %v359_v42  ;;  %vm303_vm0 = vcmp.ge.s32.totalorder %v2078_v15, 66 }
  0x2a   :  { %v2172_v56 = vmul.f32 %v467_v40, %v395_v11  ;;  %v2174_v60 = vadd.f32 -0.5, %v419_v32  ;;  %vm2176_vm1 = vcmp.lt.f32.partialorder %v429_v33, 1.0  ;;  %v2180_v62 = vadd.f32 -0.5, %v429_v33 }
  0x2b   :  { %v2184_v1 = vmul.f32 %v477_v43, %v405_v12  ;;  %vm2186_vm2 = vcmp.lt.f32.partialorder %v425_v44, 1.0  ;;  %v2190_v3 = vmul.f32 %v473_v45, %v401_v25  ;;  %v2192_v4 = vadd.f32 -0.5, %v425_v44  ;;  %v2221_v12 = vld [vmem:[%s2785_s2 + $0x18] sm:$0xff]  ;;  %v343_v43 = vld [vmem:[%s2783_s0 + $0xa8] sm:$0xff] }
  0x2c   :  { %vm809_vm3 = vcmask 154624   ;;  %v2200_v7 = vmul.f32 %v469_v49, %v397_v29  ;;  %v2202_v11 = vadd.f32 -0.5, %v421_v48  ;;  %v435_v13 = vand.u32 2147483647, %v411_v50  ;;  %v367_v44 = vld [vmem:[%s2784_s1 + $0xa8] sm:$0xff] }
  0x2d   :  { %v483_v14 = vmul.f32 0.5, %v411_v50  ;;  %vm2214_vm4 = vcmp.lt.f32.partialorder %v421_v48, 1.0  ;;  %v2228_v21 = vmul.f32 %v481_v53, %v409_v37  ;;  %v2230_v23 = vadd.f32 -0.5, %v433_v52  ;;  %v341_v53 = vld [vmem:[%s2783_s0 + $0x98] sm:$0xff] }
  0x2e   :  { %v431_v25 = vand.u32 2147483647, %v407_v54  ;;  %vm2235_vm5 = vcmp.lt.f32.partialorder %v433_v52, 1.0  ;;  %v479_v35 = vmul.f32 0.5, %v407_v54  ;;  %v417_v36 = vsub.f32 %v345_v5, %v369_v6  ;;  %v2282_v52 = vld [vmem:[%s2785_s2 + $0x30] sm:$0xff]  ;;  %v2323_v6 = vld [vmem:[%s2785_s2 + $0x8] sm:$0xff] }
  0x2f   :  { %vm2241_vm6 = vcmp.lt.f32.partialorder %v438_v0, 1.0  ;;  %v539_v33 = vsel %vm2167_vm15, %v2172_v56, %v2174_v60  ;;  %v549_v42 = vsel %vm2176_vm1, %v2184_v1, %v2180_v62  ;;  %v545_v34 = vsel %vm2186_vm2, %v2190_v3, %v2192_v4  ;;  %v365_v56 = vld [vmem:[%s2784_s1 + $0x98] sm:$0xff]  ;;  %v2303_v1 = vld [vmem:[%s2786_s3 + $0x30] sm:$0xff] }
  0x30   :  { %v681_v0 = vsub.f32 %v2207_v16, %v2212_v17  ;;  %v541_v45 = vsel %vm2214_vm4, %v2200_v7, %v2202_v11  ;;  %v2273_v48 = vmul.f32 %v483_v14, %v411_v50  ;;  %v2275_v49 = vadd.f32 -0.5, %v435_v13  ;;  %v2328_v7 = vld [vmem:[%s2786_s3 + $0x8] sm:$0xff] }
  0x31   :  { %vm2290_vm7 = vcmp.lt.f32.partialorder %v435_v13, 1.0  ;;  %v2298_v62 = vadd.f32 -0.5, %v431_v25  ;;  %v2318_v4 = vmul.f32 %v479_v35, %v407_v54  ;;  %v441_v5 = vand.u32 2147483647, %v417_v36 }
  0x32   :  { %v415_v11 = vsub.f32 %v343_v43, %v367_v44  ;;  %vm2335_vm8 = vcmp.lt.f32.partialorder %v431_v25, 1.0  ;;  %v489_v14 = vmul.f32 0.5, %v417_v36  ;;  %v413_v18 = vsub.f32 %v341_v53, %v365_v56 }
  0x33   :  { %v555_v35 = vsel %vm2290_vm7, %v2273_v48, %v2275_v49  ;;  %vm2364_vm9 = vcmp.lt.f32.partialorder %v441_v5, 1.0  ;;  %v2385_v10 = vadd.f32 -0.5, %v441_v5  ;;  %v798_v5 = vadd.f32 %v2042_v46, %v556_v8 }
  0x34   :  { %v439_v55 = vand.u32 2147483647, %v415_v11  ;;  %v2377_v61 = vmul.f32 %v489_v14, %v417_v36  ;;  %v437_v60 = vand.u32 2147483647, %v413_v18  ;;  %v2391_v36 = vld [vmem:[%s2785_s2 + $0x20] sm:$0xff]  ;;  %v558_v14 = vsel %vm2241_vm6, %v2129_v26, %v2119_v22  ;;  %v2434_v22 = vld [vmem:[%s2785_s2 + $0x38] sm:$0xff] }
  0x35   :  { %v2439_v26 = vld [vmem:[%s2786_s3 + $0x38] sm:$0xff]  ;;  %vm831_vm13 = vcmask 152576   ;;  %vm853_vm1 = vcmask 588800  }
  0x36   :  { %v2419_v46 = vadd.f32 -0.5, %v437_v60  ;;  %vm2423_vm10 = vcmp.lt.f32.partialorder %v439_v55, 1.0  ;;  %vm2427_vm11 = vcmp.lt.f32.partialorder %v437_v60, 1.0  ;;  %v2449_v60 = vld [vmem:[%s2785_s2 + $0x50] sm:$0xff] }
  0x68   :  { %v2109_v19 = vpop.permute.xlu2 %241 }
  0x69   :  { %v288_v29 = vsel %vm218_vm14, %v2109_v19, 1.0  ;;  %v2333_v13 = vsel %vm303_vm0, %v2109_v19, 1.0  ;;  %v485_v19 = vmul.f32 0.5, %v413_v18 }
  0x6a   :  { %v571_v50 = vmul.f32 %v547_v39, %v288_v29  ;;  %v2308_v39 = vld [vmem:[%s2785_s2 + $0x48] sm:$0xff]  ;;  %2830 = vst [vmem:[#allocation7_spill] sm:$0xff] %v2333_v13 }
  0x6b   :  { %v2417_v58 = vmul.f32 %v485_v19, %v413_v18 }
  0x6c   :  { %v2353_v44 = vsel %vm809_vm3, %v571_v50, 0.0  ;;  %v487_v50 = vmul.f32 0.5, %v415_v11 }
  0x70   :  { %v2182_v63 = vpop.permute.xlu2 %246 }
  0x71   :  { %v290_v56 = vsel %vm218_vm14, %v2182_v63, 1.0 }
  0x72   :  { %v573_v48 = vmul.f32 %v549_v42, %v290_v56  ;;  %v2396_v42 = vld [vmem:[%s2786_s3 + $0x20] sm:$0xff]  ;;  %v561_v56 = vsel %vm2364_vm9, %v2377_v61, %v2385_v10  ;;  %v2467_v61 = vld [vmem:[%s2786_s3 + $0x50] sm:$0xff] }
  0x73   :  { %2842 = vst [vmem:[#allocation11_spill] sm:$0xff] %v2467_v61 }
  0x76   :  { %v2245_v37 = vpop.permute.xlu1 %231  ;;  %v2251_v41 = vpop.permute.xlu0 %221 }
  0x77   :  { %v280_v3 = vsel %vm218_vm14, %v2251_v41, 1.0  ;;  %v284_v29 = vsel %vm218_vm14, %v2245_v37, 1.0  ;;  %v2482_v16 = vsel %vm303_vm0, %v2245_v37, 1.0  ;;  %v2501_v37 = vld [vmem:[%s2785_s2 + $0x28] sm:$0xff] }
  0x78   :  { %v2346_v43 = vpop.permute.xlu2 %261  ;;  %v563_v53 = vmul.f32 %v539_v33, %v280_v3  ;;  %v567_v33 = vmul.f32 %v543_v47, %v284_v29  ;;  %2843 = vst [vmem:[#allocation12_spill] sm:$0xff] %v2482_v16 }
  0x79   :  { %2844 = vst [vmem:[#allocation13_spill] sm:$0xff] %v2501_v37  ;;  %v2853_v37 = vsub.f32 %v2323_v6, %v2328_v7 }
  0x7a   :  { %v810_v27 = vsel %vm809_vm3, %v563_v53, 0.0  ;;  %v813_v59 = vsel %vm809_vm3, %v567_v33, 0.0  ;;  %v2456_v33 = vsel %vm303_vm0, %v2182_v63, 1.0  ;;  %v2477_v63 = vld [vmem:[%s2786_s3 + $0x10] sm:$0xff] }
  0x7b   :  { %2840 = vst [vmem:[#allocation9_spill] sm:$0xff] %v2456_v33 }
  0x7e   :  { %v2373_v3 = vpop.permute.xlu1 %236  ;;  %v2375_v25 = vpop.permute.xlu0 %226 }
  0x7f   :  { %v286_v51 = vsel %vm218_vm14, %v2373_v3, 1.0  ;;  %v282_v31 = vsel %vm218_vm14, %v2375_v25, 1.0 }
  0x80   :  { %v569_v28 = vmul.f32 %v545_v34, %v286_v51  ;;  %v565_v47 = vmul.f32 %v541_v45, %v282_v31  ;;  %v296_v34 = vsel %vm218_vm14, %v2346_v43, 1.0  ;;  %v2407_v45 = vmul.f32 %v487_v50, %v415_v11  ;;  %v2462_v10 = vpop.permute.xlu2 %276 }
  0x81   :  { %v2409_v51 = vadd.f32 -0.5, %v439_v55  ;;  %v579_v55 = vmul.f32 %v555_v35, %v296_v34  ;;  %v2451_v50 = vadd.f32 %v798_v5, %v558_v14  ;;  %v819_v35 = vsel %vm809_vm3, %v573_v48, 0.0  ;;  %2841 = vst [vmem:[#allocation10_spill] sm:$0xff] %v2462_v10  ;;  %v2506_v5 = vld [vmem:[%s2786_s3 + $0x28] sm:$0xff] }
  0x82   :  { %v811_v29 = vsel %vm809_vm3, %v565_v47, 0.0  ;;  %v815_v18 = vsel %vm809_vm3, %v569_v28, 0.0  ;;  %2845 = vst [vmem:[#allocation14_spill] sm:$0xff] %v2506_v5  ;;  %v2846_v34 = vand.u32 2147483647, %v1997_v9  ;;  %v307_v48 = vsel %vm303_vm0, %v2373_v3, 1.0 }
  0x83   :  { %v812_v8 = vadd.f32 %v811_v29, %v810_v27  ;;  %v654_v19 = vpop.f32.mrf.mxu1  ;;  %2839 = vst [vmem:[#allocation8_spill] sm:$0xff] %v2451_v50  ;;  %v2472_v27 = vld [vmem:[%s2785_s2 + $0x10] sm:$0xff]  ;;  %v2528_v9 = vsel %vm809_vm3, %v579_v55, 0.0  ;;  %v2560_v28 = vld [vmem:[%s2786_s3 + $0x58] sm:$0x3f]  ;;  %v305_v11 = vsel %vm303_vm0, %v2375_v25, 1.0  ;;  %v2852_v5 = vsub.f32 %v2282_v52, %v2303_v1 }
  0x84   :  { %v645_v57 = vpop.f32.mrf.mxu0  ;;  %vm2510_vm12 = vcmp.lt.f32.partialorder %v2846_v34, 1.0  ;;  %v302_v34 = vsel %vm218_vm14, %v2462_v10, 1.0  ;;  %v2856_v52 = vsel %vm2235_vm5, %v2228_v21, %v2230_v23 }
  0x85   :  { %v814_v31 = vadd.f32 %v813_v59, %v812_v8  ;;  %v693_v49 = vsub.f32 %v681_v0, %v645_v57  ;;  %v2517_v59 = vsel %vm303_vm0, %v2251_v41, 1.0  ;;  %v2522_v57 = vsel %vm303_vm0, %v2346_v43, 1.0  ;;  %v2540_v43 = vld [vmem:[%s2785_s2 + $0x40] sm:$0xff] }
  0x86   :  { %v2484_v17 = vpop.permute.xlu1 %256  ;;  %v2486_v0 = vpop.permute.xlu0 %251  ;;  %2849 = vst [vmem:[#allocation15_spill] sm:$0xff] %v2522_v57  ;;  %v2850_v8 = vsub.f32 %v2221_v12, %v2226_v20  ;;  %v2545_v12 = vld [vmem:[%s2786_s3 + $0x40] sm:$0xff]  ;;  %v2550_v20 = vld [vmem:[%s2785_s2 + $0x58] sm:$0x3f]  ;;  %v585_v3 = vmul.f32 %v561_v56, %v302_v34 }
  0x87   :  { %v816_v29 = vadd.f32 %v815_v18, %v814_v31  ;;  %v705_v55 = vand.u32 2147483647, %v693_v49  ;;  %v292_v31 = vsel %vm218_vm14, %v2486_v0, 1.0  ;;  %v294_v10 = vsel %vm218_vm14, %v2484_v17, 1.0 }
  0x88   :  { %v696_v47 = vsub.f32 %v2850_v8, %v654_v19  ;;  %v729_v19 = vmul.f32 0.5, %v693_v49  ;;  %v2851_v18 = vsel %vm2335_vm8, %v2318_v4, %v2298_v62  ;;  %v689_v54 = vsub.f32 %v2540_v43, %v2545_v12 }
  0x89   :  { %v575_v57 = vmul.f32 %v2851_v18, %v292_v31  ;;  %v818_v13 = vadd.f32 %v2353_v44, %v816_v29  ;;  %v692_v62 = vsub.f32 %v2550_v20, %v2560_v28  ;;  %vm2587_vm15 = vcmp.lt.f32.partialorder %v705_v55, 1.0 }
  0x8a   :  { %v708_v33 = vand.u32 2147483647, %v696_v47  ;;  %v732_v16 = vmul.f32 0.5, %v696_v47  ;;  %v741_v44 = vmul.f32 %v729_v19, %v693_v49  ;;  %v577_v1 = vmul.f32 %v2856_v52, %v294_v10 }
  0x8b   :  { %v672_v41 = vpop.f32.mrf.mxu3  ;;  %v820_v56 = vadd.f32 %v819_v35, %v818_v13  ;;  %v1709_v6 = vadd.f32 -0.5, %v705_v55  ;;  %v821_v7 = vsel %vm809_vm3, %v575_v57, 0.0  ;;  %v2857_v31 = vsub.f32 %v2308_v39, %v2313_v2 }
  0x8c   :  { %v663_v8 = vpop.f32.mrf.mxu2  ;;  %v648_v50 = vpop.f32.mrf.mxu0  ;;  %v744_v29 = vmul.f32 %v732_v16, %v696_v47  ;;  %v1712_v34 = vadd.f32 -0.5, %v708_v33  ;;  %vm2606_vm4 = vcmp.lt.f32.partialorder %v708_v33, 1.0  ;;  %v823_v10 = vsel %vm809_vm3, %v577_v1, 0.0 }
  0x8d   :  { %v699_v25 = vsub.f32 %v2852_v5, %v663_v8  ;;  %v694_v61 = vsub.f32 %v2853_v37, %v648_v50  ;;  %v657_v5 = vpop.f32.mrf.mxu1  ;;  %v822_v18 = vadd.f32 %v821_v7, %v820_v56  ;;  %v702_v49 = vsub.f32 %v2857_v31, %v672_v41 }
  0x8e   :  { %v2604_v13 = vpop.permute.xlu1 %271  ;;  %v2862_v39 = vsub.f32 %v2391_v36, %v2396_v42  ;;  %v267_v47 = vpop.permute.xlu0 %266  ;;  %v765_v41 = vsel %vm2587_vm15, %v741_v44, %v1709_v6  ;;  %v560_v33 = vsel %vm2510_vm12, %v2150_v38, %v2137_v30  ;;  %v768_v4 = vsel %vm2606_vm4, %v744_v29, %v1712_v34  ;;  %v2876_v6 = vld [vmem:[#allocation14_spill] sm:$0xff]  ;;  %v2891_v38 = vld [vmem:[#allocation15_spill] sm:$0xff] }
  0x8f   :  { %v706_v50 = vand.u32 2147483647, %v694_v61  ;;  %v730_v37 = vmul.f32 0.5, %v694_v61  ;;  %v711_v32 = vand.u32 2147483647, %v699_v25  ;;  %v735_v19 = vmul.f32 0.5, %v699_v25 }
  0x90   :  { %v697_v2 = vsub.f32 %v2862_v39, %v657_v5  ;;  %v824_v55 = vadd.f32 %v823_v10, %v822_v18  ;;  %v714_v8 = vand.u32 2147483647, %v702_v49  ;;  %v738_v52 = vmul.f32 0.5, %v702_v49 }
  0x91   :  { %vm2600_vm2 = vcmp.lt.f32.partialorder %v706_v50, 1.0  ;;  %v742_v23 = vmul.f32 %v730_v37, %v694_v61  ;;  %v1710_v16 = vadd.f32 -0.5, %v706_v50  ;;  %v832_v61 = vsel %vm831_vm13, %v585_v3, 0.0 }
  0x92   :  { %v300_v36 = vsel %vm218_vm14, %v2604_v13, 1.0  ;;  %v747_v44 = vmul.f32 %v735_v19, %v699_v25  ;;  %v1715_v3 = vadd.f32 -0.5, %v711_v32  ;;  %v298_v56 = vsel %vm218_vm14, %v267_v47, 1.0 }
  0x93   :  { %v766_v1 = vsel %vm2600_vm2, %v742_v23, %v1710_v16  ;;  %v675_v42 = vpop.f32.mrf.mxu3  ;;  %vm2630_vm5 = vcmp.lt.f32.partialorder %v711_v32, 1.0  ;;  %v709_v50 = vand.u32 2147483647, %v697_v2  ;;  %v733_v37 = vmul.f32 0.5, %v697_v2 }
  0x94   :  { %v666_v57 = vpop.f32.mrf.mxu2  ;;  %v778_v7 = vmul.f32 %v766_v1, %v305_v11  ;;  %v651_v5 = vpop.f32.mrf.mxu0  ;;  %v2637_v18 = vsel %vm303_vm0, %v2484_v17, 1.0  ;;  %v2865_v25 = vsel %vm2423_vm10, %v2407_v45, %v2409_v51  ;;  %v2866_v29 = vsel %vm2427_vm11, %v2417_v58, %v2419_v46 }
  0x95   :  { %v583_v24 = vmul.f32 %v2865_v25, %v300_v36  ;;  %v581_v11 = vmul.f32 %v2866_v29, %v298_v56  ;;  %v826_v34 = vadd.f32 %v2528_v9, %v824_v55  ;;  %v777_v31 = vmul.f32 %v765_v41, %v2517_v59  ;;  %v2875_v56 = vld [vmem:[#allocation13_spill] sm:$0xff] }
  0x96   :  { %v780_v32 = vmul.f32 %v768_v4, %v307_v48  ;;  %v2651_v19 = vmul.f32 %v738_v52, %v702_v49  ;;  %v2653_v17 = vadd.f32 -0.5, %v714_v8  ;;  %v771_v53 = vsel %vm2630_vm5, %v747_v44, %v1715_v3  ;;  %v2873_v4 = vld [vmem:[#allocation11_spill] sm:$0xff] }
  0x97   :  { %vm2657_vm14 = vcmp.lt.f32.partialorder %v714_v8, 1.0  ;;  %v827_v51 = vsel %vm809_vm3, %v581_v11, 0.0  ;;  %v2869_v58 = vsub.f32 %v2472_v27, %v2477_v63  ;;  %v855_v40 = vsel %vm853_vm1, %v778_v7, 0.0 }
  0x98   :  { %v745_v48 = vmul.f32 %v733_v37, %v697_v2  ;;  %v1713_v59 = vadd.f32 -0.5, %v709_v50  ;;  %v828_v9 = vadd.f32 %v827_v51, %v826_v34  ;;  %v310_v49 = vsel %vm303_vm0, %v2486_v0, 1.0  ;;  %v660_v2 = vpop.f32.mrf.mxu1  ;;  %v2879_v51 = vld [vmem:[#allocation12_spill] sm:$0xff] }
  0x99   :  { %v695_v46 = vsub.f32 %v2869_v58, %v651_v5  ;;  %vm2669_vm6 = vcmp.lt.f32.partialorder %v709_v50, 1.0  ;;  %v829_v23 = vsel %vm809_vm3, %v583_v24, 0.0  ;;  %v854_v10 = vsel %vm853_vm1, %v777_v31, 0.0  ;;  %v2878_v24 = vld [vmem:[#allocation7_spill] sm:$0xff] }
  0x9a   :  { %v859_v27 = vsel %vm853_vm1, %v780_v32, 0.0  ;;  %v830_v63 = vadd.f32 %v829_v23, %v828_v9  ;;  %v2872_v16 = vsub.f32 %v2434_v22, %v2439_v26  ;;  %v2679_v55 = vmul.f32 %v771_v53, %v310_v49 }
  0x9b   :  { %v707_v35 = vand.u32 2147483647, %v695_v46  ;;  %v856_v0 = vadd.f32 %v855_v40, %v854_v10  ;;  %v774_v8 = vsel %vm2657_vm14, %v2651_v19, %v2653_v17  ;;  %v2687_v52 = vsel %vm303_vm0, %v267_v47, 1.0 }
  0x9c   :  { %v700_v39 = vsub.f32 %v2872_v16, %v666_v57  ;;  %v669_v41 = vpop.f32.mrf.mxu2  ;;  %v769_v1 = vsel %vm2669_vm6, %v745_v48, %v1713_v59  ;;  %v833_v36 = vadd.f32 %v832_v61, %v830_v63  ;;  %v731_v22 = vmul.f32 0.5, %v695_v46  ;;  %v678_v57 = vpop.f32.mrf.mxu3 }
  0x9d   :  { %v1711_v26 = vadd.f32 -0.5, %v707_v35  ;;  %vm800_vm3 = vcmask 1045504   ;;  %v2874_v44 = vsub.f32 %v2449_v60, %v2873_v4  ;;  %vm719_vm7 = vcmp.lt.f32.partialorder %v707_v35, 1.0  ;;  %v2882_v35 = vld [vmem:[#allocation9_spill] sm:$0xff] }
  0x9e   :  { %v2877_v7 = vsub.f32 %v2875_v56, %v2876_v6  ;;  %v701_v47 = vsub.f32 %v689_v54, %v669_v41  ;;  %v834_v37 = vrot.slane %v833_v36, 4  ;;  %v712_v5 = vand.u32 2147483647, %v700_v39  ;;  %v2890_v6 = vld [vmem:[#allocation8_spill] sm:$0xff] }
  0x9f   :  { %v703_v3 = vsub.f32 %v2874_v44, %v675_v42  ;;  %v736_v61 = vmul.f32 0.5, %v700_v39  ;;  %v743_v25 = vmul.f32 %v731_v22, %v695_v46  ;;  %v781_v29 = vmul.f32 %v769_v1, %v2878_v24 }
  0xa0   :  { %v698_v50 = vsub.f32 %v2877_v7, %v660_v2  ;;  %v704_v60 = vsub.f32 %v692_v62, %v678_v57  ;;  %v835_v42 = vadd.f32 %v834_v37, %v833_v36  ;;  %v713_v32 = vand.u32 2147483647, %v701_v47 }
  0xa1   :  { %v767_v31 = vsel %vm719_vm7, %v743_v25, %v1711_v26  ;;  %v737_v53 = vmul.f32 0.5, %v701_v47  ;;  %v748_v54 = vmul.f32 %v736_v61, %v700_v39  ;;  %v1716_v40 = vadd.f32 -0.5, %v712_v5 }
  0xa2   :  { %v710_v11 = vand.u32 2147483647, %v698_v50  ;;  %v734_v34 = vmul.f32 0.5, %v698_v50  ;;  %v779_v58 = vmul.f32 %v767_v31, %v2879_v51  ;;  %v715_v46 = vand.u32 2147483647, %v703_v3 }
  0xa3   :  { %v739_v48 = vmul.f32 0.5, %v703_v3  ;;  %v836_v59 = vrot.slane %v835_v42, 2  ;;  %vm2705_vm9 = vcmp.lt.f32.partialorder %v712_v5, 1.0  ;;  %v861_v62 = vsel %vm853_vm1, %v781_v29, 0.0 }
  0xa4   :  { %vm722_vm8 = vcmp.lt.f32.partialorder %v710_v11, 1.0  ;;  %v746_v43 = vmul.f32 %v734_v34, %v698_v50  ;;  %v1714_v12 = vadd.f32 -0.5, %v710_v11  ;;  %v857_v28 = vsel %vm853_vm1, %v779_v58, 0.0  ;;  %v2894_v58 = vld [vmem:[#allocation10_spill] sm:$0xff] }
  0xa5   :  { %v858_v49 = vadd.f32 %v857_v28, %v856_v0  ;;  %v749_v21 = vmul.f32 %v737_v53, %v701_v47  ;;  %v1717_v23 = vadd.f32 -0.5, %v713_v32  ;;  %vm2712_vm10 = vcmp.lt.f32.partialorder %v713_v32, 1.0 }
  0xa6   :  { %v770_v20 = vsel %vm722_vm8, %v746_v43, %v1714_v12  ;;  %v716_v16 = vand.u32 2147483647, %v704_v60  ;;  %v740_v39 = vmul.f32 0.5, %v704_v60  ;;  %v772_v2 = vsel %vm2705_vm9, %v748_v54, %v1716_v40 }
  0xa7   :  { %v782_v10 = vmul.f32 %v770_v20, %v2882_v35  ;;  %v860_v41 = vadd.f32 %v859_v27, %v858_v49  ;;  %v2885_v1 = vlaneseq  ;;  %vm2723_vm13 = vcmp.lt.f32.partialorder %v715_v46, 1.0 }
  0xa8   :  { %v751_v22 = vmul.f32 %v739_v48, %v703_v3  ;;  %v1812_v26 = vmov 0.0   ;;  %v801_v27 = vsel %vm800_vm3, %v560_v33, 0.0  ;;  %v837_v57 = vadd.f32 %v836_v59, %v835_v42 }
  0xa9   :  { %vm2719_vm11 = vcmp.lt.s32.totalorder %v2885_v1, 147  ;;  %v1719_v4 = vadd.f32 -0.5, %v715_v46  ;;  %v862_v44 = vadd.f32 %v861_v62, %v860_v41  ;;  %v773_v56 = vsel %vm2712_vm10, %v749_v21, %v1717_v23 }
  0xaa   :  { %199 = vst.msk [vmem:[#allocation2] sm:$0x3] %vm2719_vm11, %v1812_v26  ;;  %v802_v7 = vadd.f32 %v801_v27, %v2890_v6  ;;  %v784_v3 = vmul.f32 %v772_v2, %v2637_v18  ;;  %v863_v50 = vsel %vm853_vm1, %v782_v10, 0.0  ;;  %v752_v47 = vmul.f32 %v740_v39, %v704_v60 }
  0xab   :  { %v1720_v37 = vadd.f32 -0.5, %v716_v16  ;;  %v864_v14 = vadd.f32 %v863_v50, %v862_v44  ;;  %v838_v61 = vrot.slane %v837_v57, 1  ;;  %vm200_vm12 = vcmask 581632  }
  0xac   :  { %v803_v5 = vrot.slane %v802_v7, 4  ;;  %v865_v30 = vsel %vm853_vm1, %v2679_v55, 0.0  ;;  %v785_v33 = vmul.f32 %v773_v56, %v2891_v38  ;;  %vm2743_vm15 = vcmp.lt.f32.partialorder %v716_v16, 1.0  ;;  %201 = vst.msk [vmem:[#allocation3] sm:$0x1] %vm200_vm12, %v1812_v26 }
  0xad   :  { %v775_v18 = vsel %vm2723_vm13, %v751_v22, %v1719_v4  ;;  %v866_v24 = vadd.f32 %v865_v30, %v864_v14  ;;  %v314_v11 = vsel %vm303_vm0, %v2604_v13, 1.0  ;;  %v786_v55 = vmul.f32 %v774_v8, %v2687_v52 }
  0xae   :  { %v804_v29 = vadd.f32 %v803_v5, %v802_v7  ;;  %v867_v34 = vsel %vm853_vm1, %v784_v3, 0.0  ;;  %v776_v42 = vsel %vm2743_vm15, %v752_v47, %v1720_v37  ;;  %v839_v32 = vadd.f32 %v838_v61, %v837_v57 }
  0xaf   :  { %v868_v60 = vadd.f32 %v867_v34, %v866_v24  ;;  %v787_v53 = vmul.f32 %v775_v18, %v314_v11  ;;  %v869_v51 = vsel %vm853_vm1, %v785_v33, 0.0  ;;  %v315_v13 = vsel %vm303_vm0, %v2894_v58, 1.0 }
  0xb0   :  { %v805_v31 = vrot.slane %v804_v29, 2  ;;  %v871_v19 = vsel %vm853_vm1, %v786_v55, 0.0  ;;  %v788_v17 = vmul.f32 %v776_v42, %v315_v13  ;;  %vm875_vm2 = vcmask 586752  }
  0xb1   :  { %v870_v45 = vadd.f32 %v869_v51, %v868_v60  ;;  %v842_v12 = vrot.slane %v839_v32, 7  ;;  %v873_v54 = vsel %vm853_vm1, %v787_v53, 0.0  ;;  %vm843_vm4 = vcmask 1040384   ;;  %v789_v46 = vld [vmem:[#allocation2] sm:$0x3] }
  0xb2   :  { %v806_v43 = vadd.f32 %v805_v31, %v804_v29  ;;  %v876_v59 = vsel %vm875_vm2, %v788_v17, 0.0  ;;  %vm1560_vm0 = vcmp.lt.s32.totalorder %v2078_v15, 3  ;;  %vm1571_vm1 = vcmask 147456  }
  0xb3   :  { %v872_v8 = vadd.f32 %v871_v19, %v870_v45  ;;  %vm1584_vm5 = vcmp.ge.s32.totalorder %v2078_v15, 3  ;;  %v852_v39 = vld [vmem:[#allocation3] sm:$0x1]  ;;  %vm1616_vm14 = vcmp.eq.s32.totalorder %v2078_v15, 1  ;;  %vm1613_vm6 = vcmp.eq.s32.totalorder %v2078_v15, 0 }
  0xb4   :  { %v807_v52 = vrot.slane %v806_v43, 1  ;;  %vm1620_vm3 = vcmp.eq.s32.totalorder %v2078_v15, 2  ;;  %vm1624_vm7 = vcmask 16384  }
  0xb5   :  { %v874_v40 = vadd.f32 %v873_v54, %v872_v8 }
  0xb6   :  { %v808_v48 = vadd.f32 %v807_v52, %v806_v43 }
  0xb7   :  { %v877_v9 = vadd.f32 %v876_v59, %v874_v40 }
  0xb8   :  { %v844_v28 = vsel %vm843_vm4, %v808_v48, %v842_v12 }
  0xb9   :  { %v846_v20 = vadd.f32 %v844_v28, %v789_v46  ;;  %v878_v62 = vrot.slane %v877_v9, 4 }
  0xbb   :  { %851 = vst.msk [vmem:[#allocation2] sm:$0x3] %vm2719_vm11, %v846_v20  ;;  %v879_v49 = vadd.f32 %v878_v62, %v877_v9 }
  0xbd   :  { %v880_v21 = vrot.slane %v879_v49, 2 }
  0xbf   :  { %v881_v23 = vadd.f32 %v880_v21, %v879_v49 }
  0xc1   :  { %v882_v10 = vrot.slane %v881_v23, 1 }
  0xc2   :  { %v1558_v35 = vld [vmem:[#allocation2] sm:$0x3] }
  0xc3   :  { %v1563_v63 = vperm.slane %v1558_v35, 0  ;;  %v1564_v16 = vperm.slane %v1558_v35, 1  ;;  %v883_v2 = vadd.f32 %v882_v10, %v881_v23 }
  0xc5   :  { %v1567_v41 = vsel %vm1560_vm0, %v1563_v63, 0.0  ;;  %v1586_v1 = vsel %vm1584_vm5, %v1563_v63, 0.0  ;;  %v1589_v0 = vsel %vm1571_vm1, %v1564_v16, 0.0  ;;  %v884_v26 = vadd.f32 %v883_v2, %v852_v39 }
  0xc6   :  { %v1570_v36 = vsel %vm843_vm4, %v1567_v41, 0.0  ;;  %v1588_v22 = vsel %vm843_vm4, %v1586_v1, 0.0 }
  0xc7   :  { %1574 = vadd.xlane.f32.xlu0 %v1570_v36  ;;  %v1590_v27 = vadd.f32 %v1589_v0, %v1588_v22  ;;  %886 = vst.msk [vmem:[#allocation3] sm:$0x1] %vm200_vm12, %v884_v26 }
  0xc9   :  { %1591 = vadd.xlane.f32.xlu1 %v1590_v27 }
  0xce   :  { %v1559_v57 = vld [vmem:[#allocation3] sm:$0x1] }
  0xcf   :  { %v1602_v4 = vsel %vm200_vm12, %v1559_v57, 0.0 }
  0xd0   :  { %1603 = vadd.xlane.f32.xlu2 %v1602_v4 }
 0x13a   :  { %v1575_v44 = vpop.xlane.xlu0 %1574 }
 0x13b   :  { %v1576_v56 = vrot.slane %v1575_v44, 4 }
 0x13c   :  { %v1592_v6 = vpop.xlane.xlu1 %1591 }
 0x13d   :  { %v1577_v7 = vadd.f32 %v1576_v56, %v1575_v44  ;;  %v1593_v3 = vrot.slane %v1592_v6, 4 }
 0x13f   :  { %v1578_v50 = vrot.slane %v1577_v7, 2  ;;  %v1594_v47 = vadd.f32 %v1593_v3, %v1592_v6 }
 0x141   :  { %v1595_v37 = vrot.slane %v1594_v47, 2  ;;  %v1579_v14 = vadd.f32 %v1578_v50, %v1577_v7 }
 0x143   :  { %v1596_v5 = vadd.f32 %v1595_v37, %v1594_v47  ;;  %v1580_v61 = vrot.slane %v1579_v14, 1  ;;  %v1604_v30 = vpop.xlane.xlu2 %1603 }
 0x144   :  { %v1605_v25 = vrot.slane %v1604_v30, 4 }
 0x145   :  { %v1581_v38 = vadd.f32 %v1580_v61, %v1579_v14  ;;  %v1597_v33 = vrot.slane %v1596_v5, 1 }
 0x146   :  { %v1606_v24 = vadd.f32 %v1605_v25, %v1604_v30 }
 0x147   :  { %1773 = vpush %v1581_v38  ;;  %v1598_v18 = vadd.f32 %v1597_v33, %v1596_v5 }
 0x148   :  { %v1607_v29 = vrot.slane %v1606_v24, 2 }
 0x149   :  { %1775 = vpush %v1598_v18 }
 0x14a   :  { %v1608_v11 = vadd.f32 %v1607_v29, %v1606_v24 }
 0x14c   :  { %v1609_v55 = vrot.slane %v1608_v11, 1 }
 0x14e   :  { %v1610_v34 = vadd.f32 %v1609_v55, %v1608_v11 }
 0x150   :  { %1777 = vpush %v1610_v34 }
 0x178   :  { %s1774_s2 = spop %1773 }
 0x179   :  { %s1583_s9 = smul.f32 0.0035460992, %s1774_s2 }
 0x17a   :  { %s1776_s3 = spop %1775 }
 0x17b   :  { %s1600_s8 = smul.f32 7.387707e-05, %s1776_s3  ;;  %v1614_v42 = vstv %s1583_s9 }
 0x17c   :  { %v1615_v32 = vsel %vm1613_vm6, %v1614_v42, 0.0 }
 0x17d   :  { %v1617_v60 = vstv %s1600_s8 }
 0x17e   :  { %v1618_v31 = vsel %vm1616_vm14, %v1617_v60, 0.0 }
 0x17f   :  { %v1619_v53 = vadd.f32 %v1618_v31, %v1615_v32 }
 0x181   :  { %s1778_s10 = spop %1777 }
 0x182   :  { %s1612_s11 = smul.f32 7.387707e-05, %s1778_s10 }
 0x184   :  { %v1621_v51 = vstv %s1612_s11 }
 0x185   :  { %v1622_v58 = vsel %vm1620_vm3, %v1621_v51, 0.0 }
 0x186   :  { %v1623_v13 = vadd.f32 %v1622_v58, %v1619_v53 }
 0x188   :  { %1625 = vst.msk [vmem:[#allocation4] sm:$0x1] %vm1624_vm7, %v1623_v13 }
 0x189   :  { %1636 = dma.vmem_to_hbm [thread:$0]  %s1632_s13, 16, %s1634_s16, [#allocation5]  }
 0x18a   :  { %1809 = dma.done.wait [#allocation5], 16  }
 0x18b   :  { %1810 = vsyncadd [#allocation5], 4294967280 }
 0x18c   :  { %1641 = vsyncpa [#allocation5], 1 }

</bundles_post_ra>
